<compile_context>
chip_gen: v7x
topology: tpu7x:2x2x1
jax: 0.10.0
libtpu: 0.0.40
codegen_flags: <defaults>
</compile_context>

<pallas_src>
import functools

import numpy as np
import jax
import jax.numpy as jnp
from jax import lax
from jax.experimental import pallas as pl
from jax.experimental.pallas import tpu as pltpu

NEG_SLOPE = 0.2
GROWTH = 32
TRUNK_CH = 64
DENSE_CH = TRUNK_CH + 4 * GROWTH      # 192 channels in the dense feature buffer
NUM_RRDB = 23
CONVS_PER_RRDB = 15                   # 3 RDBs x 5 separable convs


# ---------------------------------------------------------------------------
# Kernel 1: generic separable conv (depthwise 3x3 + pointwise 1x1 + bias,
#           fused activation, optional fused residual add).  Grid over batch.
# ---------------------------------------------------------------------------
def _sepconv_kernel(*refs, H, W, act, has_res):
    if has_res:
        x_ref, dw_ref, pw_ref, b_ref, res_ref, o_ref = refs
    else:
        x_ref, dw_ref, pw_ref, b_ref, o_ref = refs
        res_ref = None
    Cin = dw_ref.shape[1]
    Cout = pw_ref.shape[1]

    dw = dw_ref[...]                                     # (9, Cin) f32
    acc = jnp.zeros((H, W, Cin), jnp.float32)            # f32 depthwise accum (VPU)
    for dy in range(3):
        for dx in range(3):
            k = dy * 3 + dx
            tap = dw[k:k + 1, :].reshape(1, 1, Cin)
            acc = acc + x_ref[0, dy:dy + H, dx:dx + W, :] * tap

    # Pointwise 1x1 on the MXU: bf16 operands, f32 accumulate.
    flat = acc.reshape(H * W, Cin).astype(jnp.bfloat16)
    out = jnp.dot(flat, pw_ref[...], preferred_element_type=jnp.float32)
    out = out + b_ref[...]                               # (1, Cout) broadcast
    if act == "lrelu":
        out = jnp.where(out >= 0.0, out, out * NEG_SLOPE)
    out = out.reshape(1, H, W, Cout)
    if has_res:
        out = out + res_ref[...]
    if act == "clamp":
        out = jnp.clip(out, 0.0, 1.0)
    o_ref[...] = out


@functools.partial(jax.jit, static_argnames=("act",))
def separable_conv(x, dw, pw, b, act="none", residual=None):
    """x: (N, H, W, Cin) f32 NHWC -> (N, H, W, Cout) f32 NHWC."""
    N, H, W, Cin = x.shape
    Cout = pw.shape[1]
    xp = jnp.pad(x, ((0, 0), (1, 1), (1, 1), (0, 0)))    # zero pad (pad=1)
    has_res = residual is not None

    kernel = functools.partial(_sepconv_kernel, H=H, W=W, act=act, has_res=has_res)
    in_specs = [
        pl.BlockSpec((1, H + 2, W + 2, Cin), lambda n: (n, 0, 0, 0)),
        pl.BlockSpec((9, Cin), lambda n: (0, 0)),
        pl.BlockSpec((Cin, Cout), lambda n: (0, 0)),
        pl.BlockSpec((1, Cout), lambda n: (0, 0)),
    ]
    args = [xp, dw, pw.astype(jnp.bfloat16), b]
    if has_res:
        in_specs.append(pl.BlockSpec((1, H, W, Cout), lambda n: (n, 0, 0, 0)))
        args.append(residual)

    return pl.pallas_call(
        kernel,
        out_shape=jax.ShapeDtypeStruct((N, H, W, Cout), jnp.float32),
        grid=(N,),
        in_specs=in_specs,
        out_specs=pl.BlockSpec((1, H, W, Cout), lambda n: (n, 0, 0, 0)),
        compiler_params=pltpu.CompilerParams(dimension_semantics=("parallel",)),
    )(*args)


# ---------------------------------------------------------------------------
# Kernel 2: the whole 23-RRDB trunk in one pallas_call, grid = (batch, RRDB).
#   - trunk activation carried in VMEM scratch across the RRDB grid axis
#   - dense 192-ch feature map (with zero halo) lives in VMEM scratch; each
#     conv writes its 32 new channels in place (no concatenate, no re-pad)
#   - per-RRDB weights streamed via BlockSpec (zero-padded to uniform shapes;
#     the padded channels have zero dw taps / zero pw rows, so they are inert)
# ---------------------------------------------------------------------------
def _trunk_kernel(x1_ref, dw_ref, pw_ref, b_ref, o_ref, x_scr, feat_scr, *, H, W):
    i = pl.program_id(1)                                  # RRDB index (sequential)

    @pl.when(i == 0)
    def _init():
        feat_scr[...] = jnp.zeros_like(feat_scr)          # zero halo, once per batch elem
        x_scr[...] = x1_ref[...]                          # trunk carry := conv1 output

    rrdb_in = x_scr[0]                                    # (H, W, 64) f32
    x = rrdb_in
    for rdb in range(3):
        rdb_in = x
        feat_scr[0, 1:H + 1, 1:W + 1, 0:TRUNK_CH] = x     # base channels of dense block
        for c in range(5):
            k = rdb * 5 + c
            dw = dw_ref[0, k]                             # (9, 192) f32, zero-padded
            acc = jnp.zeros((H, W, DENSE_CH), jnp.float32)
            for dy in range(3):
                for dx in range(3):
                    t = dy * 3 + dx
                    tap = dw[t:t + 1, :].reshape(1, 1, DENSE_CH)
                    acc = acc + feat_scr[0, dy:dy + H, dx:dx + W, :] * tap
            flat = acc.reshape(H * W, DENSE_CH).astype(jnp.bfloat16)
            out = jnp.dot(flat, pw_ref[0, k], preferred_element_type=jnp.float32)
            out = out + b_ref[0, k]
            out = out.reshape(H, W, TRUNK_CH)
            if c < 4:
                out = jnp.where(out >= 0.0, out, out * NEG_SLOPE)
                lo = TRUNK_CH + GROWTH * c
                feat_scr[0, 1:H + 1, 1:W + 1, lo:lo + GROWTH] = out[:, :, :GROWTH]
            else:
                x = out * 0.2 + rdb_in                    # RDB residual
    x = x * 0.2 + rrdb_in                                 # RRDB residual
    x_scr[0] = x
    o_ref[0] = x


@jax.jit
def trunk_forward(out1, dw_stack, pw_stack, b_stack):
    """out1: (N, H, W, 64) f32 -> trunk output, same shape."""
    N, H, W, _ = out1.shape
    kernel = functools.partial(_trunk_kernel, H=H, W=W)
    return pl.pallas_call(
        kernel,
        out_shape=jax.ShapeDtypeStruct((N, H, W, TRUNK_CH), jnp.float32),
        grid=(N, NUM_RRDB),
        in_specs=[
            pl.BlockSpec((1, H, W, TRUNK_CH), lambda n, i: (n, 0, 0, 0)),
            pl.BlockSpec((1, CONVS_PER_RRDB, 9, DENSE_CH), lambda n, i: (i, 0, 0, 0)),
            pl.BlockSpec((1, CONVS_PER_RRDB, DENSE_CH, TRUNK_CH), lambda n, i: (i, 0, 0, 0)),
            pl.BlockSpec((1, CONVS_PER_RRDB, 1, TRUNK_CH), lambda n, i: (i, 0, 0, 0)),
        ],
        out_specs=pl.BlockSpec((1, H, W, TRUNK_CH), lambda n, i: (n, 0, 0, 0)),
        scratch_shapes=[
            pltpu.VMEM((1, H, W, TRUNK_CH), jnp.float32),          # trunk carry
            pltpu.VMEM((1, H + 2, W + 2, DENSE_CH), jnp.float32),  # dense feat + halo
        ],
        compiler_params=pltpu.CompilerParams(
            dimension_semantics=("parallel", "arbitrary")),
    )(out1, dw_stack, pw_stack.astype(jnp.bfloat16), b_stack)


# ---------------------------------------------------------------------------
# Parameter init (deterministic synthetic weights) + trunk weight packing
# ---------------------------------------------------------------------------
def _init_sep(rng, cin, cout):
    dw = (rng.standard_normal((9, cin)) * (np.sqrt(2.0 / 9.0) * 0.1)).astype(np.float32)
    pw = (rng.standard_normal((cin, cout)) * (np.sqrt(2.0 / cin) * 0.1)).astype(np.float32)
    b = np.zeros((1, cout), np.float32)
    return dict(dw=dw, pw=pw, b=b)


def init_generator_params_np(seed=0, in_channels=3, out_channels=3):
    rng = np.random.default_rng(seed)
    p = {"conv1": _init_sep(rng, in_channels, TRUNK_CH)}
    trunk = []
    cins = [TRUNK_CH + i * GROWTH for i in range(5)]
    couts = [GROWTH] * 4 + [TRUNK_CH]
    for _ in range(NUM_RRDB):
        rrdb = [[_init_sep(rng, ci, co) for ci, co in zip(cins, couts)] for _ in range(3)]
        trunk.append(rrdb)
    p["trunk"] = trunk
    p["conv2"] = _init_sep(rng, TRUNK_CH, TRUNK_CH)
    p["up1"] = _init_sep(rng, TRUNK_CH, TRUNK_CH)
    p["up2"] = _init_sep(rng, TRUNK_CH, TRUNK_CH)
    p["conv3"] = _init_sep(rng, TRUNK_CH, TRUNK_CH)
    p["conv4"] = _init_sep(rng, TRUNK_CH, out_channels)
    return p


def pack_trunk(trunk_np):
    """Stack trunk weights, zero-padded to uniform (192, 64) shapes."""
    dw = np.zeros((NUM_RRDB, CONVS_PER_RRDB, 9, DENSE_CH), np.float32)
    pw = np.zeros((NUM_RRDB, CONVS_PER_RRDB, DENSE_CH, TRUNK_CH), np.float32)
    b = np.zeros((NUM_RRDB, CONVS_PER_RRDB, 1, TRUNK_CH), np.float32)
    for r in range(NUM_RRDB):
        for d in range(3):
            for c in range(5):
                conv = trunk_np[r][d][c]
                k = d * 5 + c
                cin = conv["dw"].shape[1]
                cout = conv["pw"].shape[1]
                dw[r, k, :, :cin] = conv["dw"]
                pw[r, k, :cin, :cout] = conv["pw"]
                b[r, k, 0, :cout] = conv["b"][0]
    return jnp.asarray(dw), jnp.asarray(pw), jnp.asarray(b)


# ---------------------------------------------------------------------------
# Generator forward (Pallas path)
# ---------------------------------------------------------------------------
def _upsample_nearest_2x(x):
    # TODO(synk): fuse the nearest-2x upsample into the up1/up2 conv kernels to
    # avoid one full-resolution HBM round trip per upsampling stage.
    return jnp.repeat(jnp.repeat(x, 2, axis=1), 2, axis=2)


@jax.jit
def generator_forward(heads, trunk_dw, trunk_pw, trunk_b, x_nchw):
    # x_nchw: (N, C, H, W).  upscale_factor=4 => PixelUnshuffle(1) is identity.
    x = jnp.transpose(x_nchw, (0, 2, 3, 1)).astype(jnp.float32)   # -> NHWC

    c1 = heads["conv1"]
    out1 = separable_conv(x, c1["dw"], c1["pw"], c1["b"], act="none")

    trunk_out = trunk_forward(out1, trunk_dw, trunk_pw, trunk_b)

    c2 = heads["conv2"]
    out = separable_conv(trunk_out, c2["dw"], c2["pw"], c2["b"],
                         act="none", residual=out1)               # fused out1 + conv2(.)

    u1, u2, c3, c4 = heads["up1"], heads["up2"], heads["conv3"], heads["conv4"]
    out = separable_conv(_upsample_nearest_2x(out), u1["dw"], u1["pw"], u1["b"], act="lrelu")
    out = separable_conv(_upsample_nearest_2x(out), u2["dw"], u2["pw"], u2["b"], act="lrelu")
    out = separable_conv(out, c3["dw"], c3["pw"], c3["b"], act="lrelu")
    out = separable_conv(out, c4["dw"], c4["pw"], c4["b"], act="clamp")

    return jnp.transpose(out, (0, 3, 1, 2))                       # back to NCHW


# ---------------------------------------------------------------------------
# Pure-JAX f32 reference (independent formulation: concatenation + unpadded
# weights) for tolerance checking the fused Pallas kernels.
# ---------------------------------------------------------------------------
def _ref_sepconv(x, conv, act="none"):
    dw, pw, b = conv["dw"], conv["pw"], conv["b"]
    N, H, W, Cin = x.shape
    xp = jnp.pad(x, ((0, 0), (1, 1), (1, 1), (0, 0)))
    acc = jnp.zeros((N, H, W, Cin), jnp.float32)
    for dy in range(3):
        for dx in range(3):
            acc = acc + xp[:, dy:dy + H, dx:dx + W, :] * dw[dy * 3 + dx].reshape(1, 1, 1, Cin)
    out = jnp.einsum("nhwc,cd->nhwd", acc, pw,
                     precision=lax.Precision.HIGHEST) + b.reshape(1, 1, 1, -1)
    if act == "lrelu":
        out = jnp.where(out >= 0.0, out, out * NEG_SLOPE)
    elif act == "clamp":
        out = jnp.clip(out, 0.0, 1.0)
    return out


def _ref_rdb(x, convs):
    o1 = _ref_sepconv(x, convs[0], "lrelu")
    o2 = _ref_sepconv(jnp.concatenate([x, o1], -1), convs[1], "lrelu")
    o3 = _ref_sepconv(jnp.concatenate([x, o1, o2], -1), convs[2], "lrelu")
    o4 = _ref_sepconv(jnp.concatenate([x, o1, o2, o3], -1), convs[3], "lrelu")
    o5 = _ref_sepconv(jnp.concatenate([x, o1, o2, o3, o4], -1), convs[4], "none")
    return o5 * 0.2 + x


def _ref_rrdb(x, rrdb):
    out = _ref_rdb(x, rrdb[0])
    out = _ref_rdb(out, rrdb[1])
    out = _ref_rdb(out, rrdb[2])
    return out * 0.2 + x


@jax.jit
def reference_trunk(trunk_params, x):
    stacked = jax.tree_util.tree_map(lambda *xs: jnp.stack(xs, 0), *trunk_params)

    def body(carry, w):
        return _ref_rrdb(carry, w), None

    out, _ = lax.scan(body, x, stacked)
    return out


@jax.jit
def reference_forward(params, x_nchw):
    x = jnp.transpose(x_nchw, (0, 2, 3, 1)).astype(jnp.float32)
    out1 = _ref_sepconv(x, params["conv1"], "none")
    t = reference_trunk(params["trunk"], out1)
    out = out1 + _ref_sepconv(t, params["conv2"], "none")
    out = _ref_sepconv(_upsample_nearest_2x(out), params["up1"], "lrelu")
    out = _ref_sepconv(_upsample_nearest_2x(out), params["up2"], "lrelu")
    out = _ref_sepconv(out, params["conv3"], "lrelu")
    out = _ref_sepconv(out, params["conv4"], "clamp")
    return jnp.transpose(out, (0, 3, 1, 2))


# ---------------------------------------------------------------------------
if __name__ == "__main__":
    key = jax.random.PRNGKey(0)
    x = jax.random.uniform(key, (2, 3, 16, 16), dtype=jnp.float32)

    params_np = init_generator_params_np(seed=0, in_channels=3, out_channels=3)
    params = jax.tree_util.tree_map(jnp.asarray, params_np)
    trunk_dw, trunk_pw, trunk_b = pack_trunk(params_np["trunk"])
    heads = {k: params[k] for k in ("conv1", "conv2", "up1", "up2", "conv3", "conv4")}

    # Full forward (Pallas path).
    y = generator_forward(heads, trunk_dw, trunk_pw, trunk_b, x)
    y = jax.block_until_ready(y)
    assert y.shape == (2, 3, 64, 64), y.shape
    assert not bool(jnp.any(jnp.isnan(y)))
    assert bool(jnp.all(y >= 0.0)) and bool(jnp.all(y <= 1.0))

    # Numerical checks against the pure-JAX f32 reference (bf16 drift only).
    x_nhwc = jnp.transpose(x, (0, 2, 3, 1)).astype(jnp.float32)
    c1 = heads["conv1"]
    out1_p = separable_conv(x_nhwc, c1["dw"], c1["pw"], c1["b"], act="none")
    out1_r = _ref_sepconv(x_nhwc, params["conv1"], "none")
    err_conv = float(jnp.max(jnp.abs(out1_p - out1_r)))
    assert err_conv < 2e-3, f"sepconv kernel mismatch: {err_conv}"

    trunk_p = trunk_forward(out1_p, trunk_dw, trunk_pw, trunk_b)
    trunk_r = reference_trunk(params["trunk"], out1_p)
    d_p = trunk_p - out1_p
    d_r = trunk_r - out1_p
    scale = float(jnp.max(jnp.abs(d_r))) + 1e-8
    err_trunk = float(jnp.max(jnp.abs(d_p - d_r)))
    assert err_trunk < 0.1 * scale + 1e-6, f"trunk kernel mismatch: {err_trunk} vs scale {scale}"

    y_ref = jax.block_until_ready(reference_forward(params, x))
    err_full = float(jnp.max(jnp.abs(y - y_ref)))
    assert err_full < 2e-3, f"full forward mismatch: {err_full}"

    print("KERNEL_OK")
</pallas_src>

<mosaic_0001>
module attributes {stable_mosaic.version = 11 : i64} {
  func.func @_sepconv_kernel(%arg0: i32, %arg1: memref<1x18x18x3xf32, #tpu.memory_space<vmem>>, %arg2: memref<9x3xf32, #tpu.memory_space<vmem>>, %arg3: memref<3x64xbf16, #tpu.memory_space<vmem>>, %arg4: memref<1x64xf32, #tpu.memory_space<vmem>>, %arg5: memref<1x16x16x64xf32, #tpu.memory_space<vmem>>) attributes {dimension_semantics = [#tpu.dimension_semantics<parallel>], iteration_bounds = array<i64: 2>, scalar_prefetch = 0 : i64, scratch_operands = 0 : i64, tpu.core_type = #tpu.core_type<tc>, window_params = [{transform_indices = @transform_0, window_bounds = array<i64: 1, 18, 18, 3>}, {pipeline_mode = #tpu.pipeline_mode<synchronous>, transform_indices = @transform_1, window_bounds = array<i64: 9, 3>}, {pipeline_mode = #tpu.pipeline_mode<synchronous>, transform_indices = @transform_2, window_bounds = array<i64: 3, 64>}, {pipeline_mode = #tpu.pipeline_mode<synchronous>, transform_indices = @transform_3, window_bounds = array<i64: 1, 64>}, {transform_indices = @transform_4, window_bounds = array<i64: 1, 16, 16, 64>}]} {
    %c0 = arith.constant 0 : index
    %c0_0 = arith.constant 0 : index
    %0 = vector.load %arg2[%c0, %c0_0] : memref<9x3xf32, #tpu.memory_space<vmem>>, vector<9x3xf32>
    %cst = arith.constant 0.000000e+00 : f32
    %1 = vector.broadcast %cst : f32 to vector<16x16x3xf32>
    %2 = vector.extract_strided_slice %0 {offsets = [0, 0], sizes = [1, 3], strides = [1, 1]} : vector<9x3xf32> to vector<1x3xf32>
    %3 = vector.shape_cast %2 : vector<1x3xf32> to vector<1x1x3xf32>
    %c0_1 = arith.constant 0 : index
    %c0_2 = arith.constant 0 : index
    %c0_3 = arith.constant 0 : index
    %c0_4 = arith.constant 0 : index
    %4 = vector.load %arg1[%c0_1, %c0_2, %c0_3, %c0_4] : memref<1x18x18x3xf32, #tpu.memory_space<vmem>>, vector<1x16x16x3xf32>
    %5 = vector.shape_cast %4 : vector<1x16x16x3xf32> to vector<16x16x3xf32>
    %6 = vector.broadcast %3 : vector<1x1x3xf32> to vector<16x16x3xf32>
    %7 = arith.mulf %5, %6 : vector<16x16x3xf32>
    %8 = arith.addf %1, %7 : vector<16x16x3xf32>
    %9 = vector.extract_strided_slice %0 {offsets = [1, 0], sizes = [1, 3], strides = [1, 1]} : vector<9x3xf32> to vector<1x3xf32>
    %10 = vector.shape_cast %9 : vector<1x3xf32> to vector<1x1x3xf32>
    %c0_5 = arith.constant 0 : index
    %c0_6 = arith.constant 0 : index
    %c1 = arith.constant 1 : index
    %c0_7 = arith.constant 0 : index
    %11 = vector.load %arg1[%c0_5, %c0_6, %c1, %c0_7] : memref<1x18x18x3xf32, #tpu.memory_space<vmem>>, vector<1x16x16x3xf32>
    %12 = vector.shape_cast %11 : vector<1x16x16x3xf32> to vector<16x16x3xf32>
    %13 = vector.broadcast %10 : vector<1x1x3xf32> to vector<16x16x3xf32>
    %14 = arith.mulf %12, %13 : vector<16x16x3xf32>
    %15 = arith.addf %8, %14 : vector<16x16x3xf32>
    %16 = vector.extract_strided_slice %0 {offsets = [2, 0], sizes = [1, 3], strides = [1, 1]} : vector<9x3xf32> to vector<1x3xf32>
    %17 = vector.shape_cast %16 : vector<1x3xf32> to vector<1x1x3xf32>
    %c0_8 = arith.constant 0 : index
    %c0_9 = arith.constant 0 : index
    %c2 = arith.constant 2 : index
    %c0_10 = arith.constant 0 : index
    %18 = vector.load %arg1[%c0_8, %c0_9, %c2, %c0_10] : memref<1x18x18x3xf32, #tpu.memory_space<vmem>>, vector<1x16x16x3xf32>
    %19 = vector.shape_cast %18 : vector<1x16x16x3xf32> to vector<16x16x3xf32>
    %20 = vector.broadcast %17 : vector<1x1x3xf32> to vector<16x16x3xf32>
    %21 = arith.mulf %19, %20 : vector<16x16x3xf32>
    %22 = arith.addf %15, %21 : vector<16x16x3xf32>
    %23 = vector.extract_strided_slice %0 {offsets = [3, 0], sizes = [1, 3], strides = [1, 1]} : vector<9x3xf32> to vector<1x3xf32>
    %24 = vector.shape_cast %23 : vector<1x3xf32> to vector<1x1x3xf32>
    %c0_11 = arith.constant 0 : index
    %c1_12 = arith.constant 1 : index
    %c0_13 = arith.constant 0 : index
    %c0_14 = arith.constant 0 : index
    %25 = vector.load %arg1[%c0_11, %c1_12, %c0_13, %c0_14] : memref<1x18x18x3xf32, #tpu.memory_space<vmem>>, vector<1x16x16x3xf32>
    %26 = vector.shape_cast %25 : vector<1x16x16x3xf32> to vector<16x16x3xf32>
    %27 = vector.broadcast %24 : vector<1x1x3xf32> to vector<16x16x3xf32>
    %28 = arith.mulf %26, %27 : vector<16x16x3xf32>
    %29 = arith.addf %22, %28 : vector<16x16x3xf32>
    %30 = vector.extract_strided_slice %0 {offsets = [4, 0], sizes = [1, 3], strides = [1, 1]} : vector<9x3xf32> to vector<1x3xf32>
    %31 = vector.shape_cast %30 : vector<1x3xf32> to vector<1x1x3xf32>
    %c0_15 = arith.constant 0 : index
    %c1_16 = arith.constant 1 : index
    %c1_17 = arith.constant 1 : index
    %c0_18 = arith.constant 0 : index
    %32 = vector.load %arg1[%c0_15, %c1_16, %c1_17, %c0_18] : memref<1x18x18x3xf32, #tpu.memory_space<vmem>>, vector<1x16x16x3xf32>
    %33 = vector.shape_cast %32 : vector<1x16x16x3xf32> to vector<16x16x3xf32>
    %34 = vector.broadcast %31 : vector<1x1x3xf32> to vector<16x16x3xf32>
    %35 = arith.mulf %33, %34 : vector<16x16x3xf32>
    %36 = arith.addf %29, %35 : vector<16x16x3xf32>
    %37 = vector.extract_strided_slice %0 {offsets = [5, 0], sizes = [1, 3], strides = [1, 1]} : vector<9x3xf32> to vector<1x3xf32>
    %38 = vector.shape_cast %37 : vector<1x3xf32> to vector<1x1x3xf32>
    %c0_19 = arith.constant 0 : index
    %c1_20 = arith.constant 1 : index
    %c2_21 = arith.constant 2 : index
    %c0_22 = arith.constant 0 : index
    %39 = vector.load %arg1[%c0_19, %c1_20, %c2_21, %c0_22] : memref<1x18x18x3xf32, #tpu.memory_space<vmem>>, vector<1x16x16x3xf32>
    %40 = vector.shape_cast %39 : vector<1x16x16x3xf32> to vector<16x16x3xf32>
    %41 = vector.broadcast %38 : vector<1x1x3xf32> to vector<16x16x3xf32>
    %42 = arith.mulf %40, %41 : vector<16x16x3xf32>
    %43 = arith.addf %36, %42 : vector<16x16x3xf32>
    %44 = vector.extract_strided_slice %0 {offsets = [6, 0], sizes = [1, 3], strides = [1, 1]} : vector<9x3xf32> to vector<1x3xf32>
    %45 = vector.shape_cast %44 : vector<1x3xf32> to vector<1x1x3xf32>
    %c0_23 = arith.constant 0 : index
    %c2_24 = arith.constant 2 : index
    %c0_25 = arith.constant 0 : index
    %c0_26 = arith.constant 0 : index
    %46 = vector.load %arg1[%c0_23, %c2_24, %c0_25, %c0_26] : memref<1x18x18x3xf32, #tpu.memory_space<vmem>>, vector<1x16x16x3xf32>
    %47 = vector.shape_cast %46 : vector<1x16x16x3xf32> to vector<16x16x3xf32>
    %48 = vector.broadcast %45 : vector<1x1x3xf32> to vector<16x16x3xf32>
    %49 = arith.mulf %47, %48 : vector<16x16x3xf32>
    %50 = arith.addf %43, %49 : vector<16x16x3xf32>
    %51 = vector.extract_strided_slice %0 {offsets = [7, 0], sizes = [1, 3], strides = [1, 1]} : vector<9x3xf32> to vector<1x3xf32>
    %52 = vector.shape_cast %51 : vector<1x3xf32> to vector<1x1x3xf32>
    %c0_27 = arith.constant 0 : index
    %c2_28 = arith.constant 2 : index
    %c1_29 = arith.constant 1 : index
    %c0_30 = arith.constant 0 : index
    %53 = vector.load %arg1[%c0_27, %c2_28, %c1_29, %c0_30] : memref<1x18x18x3xf32, #tpu.memory_space<vmem>>, vector<1x16x16x3xf32>
    %54 = vector.shape_cast %53 : vector<1x16x16x3xf32> to vector<16x16x3xf32>
    %55 = vector.broadcast %52 : vector<1x1x3xf32> to vector<16x16x3xf32>
    %56 = arith.mulf %54, %55 : vector<16x16x3xf32>
    %57 = arith.addf %50, %56 : vector<16x16x3xf32>
    %58 = vector.extract_strided_slice %0 {offsets = [8, 0], sizes = [1, 3], strides = [1, 1]} : vector<9x3xf32> to vector<1x3xf32>
    %59 = vector.shape_cast %58 : vector<1x3xf32> to vector<1x1x3xf32>
    %c0_31 = arith.constant 0 : index
    %c2_32 = arith.constant 2 : index
    %c2_33 = arith.constant 2 : index
    %c0_34 = arith.constant 0 : index
    %60 = vector.load %arg1[%c0_31, %c2_32, %c2_33, %c0_34] : memref<1x18x18x3xf32, #tpu.memory_space<vmem>>, vector<1x16x16x3xf32>
    %61 = vector.shape_cast %60 : vector<1x16x16x3xf32> to vector<16x16x3xf32>
    %62 = vector.broadcast %59 : vector<1x1x3xf32> to vector<16x16x3xf32>
    %63 = arith.mulf %61, %62 : vector<16x16x3xf32>
    %64 = arith.addf %57, %63 : vector<16x16x3xf32>
    %65 = vector.shape_cast %64 : vector<16x16x3xf32> to vector<256x3xf32>
    %66 = arith.truncf %65 : vector<256x3xf32> to vector<256x3xbf16>
    %c0_35 = arith.constant 0 : index
    %c0_36 = arith.constant 0 : index
    %67 = vector.load %arg3[%c0_35, %c0_36] : memref<3x64xbf16, #tpu.memory_space<vmem>>, vector<3x64xbf16>
    %cst_37 = arith.constant dense<0.000000e+00> : vector<256x64xf32>
    %68 = tpu.matmul %66, %67, %cst_37 {dimension_numbers = #tpu.dot_dimension_numbers<[1], [0], [0], [1], [0, 0, 1, 1], [], []>} : vector<256x3xbf16>, vector<3x64xbf16>, vector<256x64xf32> -> vector<256x64xf32>
    %c0_38 = arith.constant 0 : index
    %c0_39 = arith.constant 0 : index
    %69 = vector.load %arg4[%c0_38, %c0_39] : memref<1x64xf32, #tpu.memory_space<vmem>>, vector<1x64xf32>
    %70 = vector.broadcast %69 : vector<1x64xf32> to vector<256x64xf32>
    %71 = arith.addf %68, %70 : vector<256x64xf32>
    %72 = vector.shape_cast %71 : vector<256x64xf32> to vector<1x16x16x64xf32>
    %c0_40 = arith.constant 0 : index
    %c0_41 = arith.constant 0 : index
    %c0_42 = arith.constant 0 : index
    %c0_43 = arith.constant 0 : index
    %73 = vector.load %arg5[%c0_40, %c0_41, %c0_42, %c0_43] : memref<1x16x16x64xf32, #tpu.memory_space<vmem>>, vector<1x16x16x64xf32>
    tpu.vector_store %arg5[%c0_40, %c0_41, %c0_42, %c0_43], %72 {strides = array<i32>} : memref<1x16x16x64xf32, #tpu.memory_space<vmem>>, vector<1x16x16x64xf32>,
    return
  }
  func.func @transform_0(%arg0: i32) -> (i32, i32, i32, i32) {
    %c0_i32 = arith.constant 0 : i32
    %c0_i32_0 = arith.constant 0 : i32
    %c0_i32_1 = arith.constant 0 : i32
    %c0_i32_2 = arith.constant 0 : i32
    return %arg0, %c0_i32, %c0_i32_0, %c0_i32_1 : i32, i32, i32, i32
  }
  func.func @transform_1(%arg0: i32) -> (i32, i32) {
    %c0_i32 = arith.constant 0 : i32
    %c0_i32_0 = arith.constant 0 : i32
    %c0_i32_1 = arith.constant 0 : i32
    return %c0_i32, %c0_i32_0 : i32, i32
  }
  func.func @transform_2(%arg0: i32) -> (i32, i32) {
    %c0_i32 = arith.constant 0 : i32
    %c0_i32_0 = arith.constant 0 : i32
    %c0_i32_1 = arith.constant 0 : i32
    return %c0_i32, %c0_i32_0 : i32, i32
  }
  func.func @transform_3(%arg0: i32) -> (i32, i32) {
    %c0_i32 = arith.constant 0 : i32
    %c0_i32_0 = arith.constant 0 : i32
    %c0_i32_1 = arith.constant 0 : i32
    return %c0_i32, %c0_i32_0 : i32, i32
  }
  func.func @transform_4(%arg0: i32) -> (i32, i32, i32, i32) {
    %c0_i32 = arith.constant 0 : i32
    %c0_i32_0 = arith.constant 0 : i32
    %c0_i32_1 = arith.constant 0 : i32
    %c0_i32_2 = arith.constant 0 : i32
    return %arg0, %c0_i32, %c0_i32_0, %c0_i32_1 : i32, i32, i32, i32
  }
}

</mosaic_0001>

<bundles_post_ra>
// kernel: separable_conv.1
= control target key start
LH: loop header
LB: loop body
LE: loop exit
PB: predicated region body
PF: predicated region fallthrough
CT: control target
= control target key end

     0   :  { %9 = vsyncpa [#allocation3], 0  ;;  %s2983_s0 = inlined_call_operand.vmem [shape: f32[2,18,18,3], index: 0, kind: input, shape index: {}]   ;;  %s2984_s1 = inlined_call_operand.vmem [shape: f32[9,3], index: 1, kind: input, shape index: {}]   ;;  %s2985_s2 = inlined_call_operand.vmem [shape: bf16[3,64], index: 2, kind: input, shape index: {}]   ;;  %s2986_s3 = inlined_call_operand.vmem [shape: f32[1,64], index: 3, kind: input, shape index: {}]   ;;  %s2987_s4 = inlined_call_operand.hbm [shape: f32[2,16,16,64], index: 4, kind: output, shape index: {}]  }
   0x1   :  { %11 = vsyncpa [#allocation3 + $0x1], 0  ;;  %s1863_s15 = smov 0   ;;  %s1865_s16 = smov 0  }
   0x2   :  { %s1867_s17 = smov 0   ;;  %s1869_s18 = smov 0  }
   0x3 LB: > { %s1884_s19 = sadd.s32 4294967295, %s1832_s18   ;;  %s1451_s20 = sadd.s32 4294967294, %s1832_s18   ;;  %s1832_s18 = sphi %s1869_s18, %s2993_s18   ;;  %s1828_s17 = sphi %s1867_s17, %s2992_s17   ;;  %s1824_s16 = sphi %s1865_s16, %s2991_s16   ;;  %s1820_s15 = sphi %s1863_s15, %s2990_s15  }
   0x4   : > { %s1888_s21 = sadd.s32 1, %s1832_s18   ;;  %s113_s22 = sadd.s32 1, %s1828_s17 }
   0x5   : > { %s110_s23 = ssub.s32 %s1832_s18, %s1888_s21  ;;  %p123_p0 = scmp.ne.s32.totalorder %s1828_s17, %s1824_s16 }
   0x6   : > { %p111_p1 = scmp.eq.s32.totalorder %s110_s23, 0  ;;  %p124_p2 = scmp.eq.s32.totalorder %s1884_s19, 1 }
   0x7   : > { %p129_p3 = scmp.ne.s32.totalorder %s1824_s16, %s1820_s15  ;;  %p130_p4 = scmp.eq.s32.totalorder %s1451_s20, 1 }
   0x8   : > { %s1899_s24 = scalar_select %p111_p1, %s1828_s17, %s113_s22  }
   0x9   : > { %p1901_p5 = por %p124_p2, %p123_p0  ;;  %p1905_p6 = por %p130_p4, %p129_p3 }
   0xa   : > { %p1454_p7 = scmp.ge.s32.totalorder %s1832_s18, 1  ;;  %p165_p8 = scmp.lt.s32.totalorder %s1832_s18, 3 }
   0xc   : > { %p166_p9 = pnand %p1454_p7, %p165_p8 }
   0xd   : > { %v1117_v0 = vld [vmem:[%s2985_s2] sm:$0x3] (!%p166_p9)  ;;  %vm1174_vm0 = vcmask (!%p166_p9), 1040384   ;;  %vm1175_vm1 = vcmask (!%p166_p9), 1041408   ;;  %p191_p10 = scmp.lt.s32.totalorder (!%p166_p9), %s1884_s19, 1  ;;  %v231_v1 = vlaneseq (!%p166_p9)  ;;  %v1834_v2 = vmov (!%p166_p9), 65535  }
   0xe   : > { %169 = sbr.rel (%p166_p9) target bundleno = 409 (0x199), region = 36  ;;  %v1176_v3 = vsel (!%p166_p9), %vm1174_vm0, 4294967295, %v1834_v2  ;;  %v197_v7 = vld [vmem:[%s2984_s1] sm:$0xff] (!%p166_p9)  ;;  %v1944_v26 = vld [vmem:[%s2984_s1 + $0x8] ss:$0 sm:$0xff] (!%p166_p9)  ;;  %vm1125_vm2 = vcmask (!%p166_p9), 23552  }
   0xf   : > { %v1177_v4 = vsel (!%p166_p9), %vm1175_vm1, %v1176_v3, 0  ;;  %v232_v5 = vshrl.u32 (!%p166_p9), %v231_v1, 7  ;;  %s188_s14 = sand.u32 (!%p166_p9), 1, %s1824_s16   ;;  %vm1342_vm3 = vcmask (!%p166_p9), 523264   ;;  %s1672_s28 = sshll.u32 (!%p166_p9), %s1884_s19, 12 }
  0x10   : > { %v1179_v6 = vand.u32 (!%p166_p9), %v1177_v4, %v1117_v0  ;;  %s1455_s20 = sshll.u32 (!%p166_p9), %s188_s14, 8  ;;  %s1835_s8 = smov (!%p166_p9), [#allocation2]  }
  0x11   : > { %v233_v8 = vsub.s32 (!%p166_p9), 0, %v232_v5  ;;  %v333_v9 = vsub.s32 (!%p166_p9), 1, %v232_v5  ;;  %v433_v10 = vsub.s32 (!%p166_p9), 2, %v232_v5  ;;  %v534_v11 = vsub.s32 (!%p166_p9), 3, %v232_v5  ;;  %s2835_s27 = scalar_lea.vmem (!%p166_p9), [#allocation2], %s1455_s20 }
  0x12   : > { %1690 = vmatprep.subr.bf16.mxu0 (!%p166_p9), %v1179_v6  ;;  %1724 = vmatprep.subr.bf16.mxu1 (!%p166_p9), %v1179_v6  ;;  %v634_v12 = vsub.s32 (!%p166_p9), 4, %v232_v5  ;;  %v734_v13 = vsub.s32 (!%p166_p9), 5, %v232_v5  ;;  %v835_v14 = vsub.s32 (!%p166_p9), 6, %v232_v5  ;;  %v935_v15 = vsub.s32 (!%p166_p9), 7, %v232_v5 }
  0x13   : > { %1691 = vmatpush3.bf16.msra.mxu0 (!%p166_p9), %v1179_v6  ;;  %1725 = vmatpush3.bf16.msra.mxu1 (!%p166_p9), %v1179_v6  ;;  %v1924_v16 = vrot.slane (!%p166_p9), %v197_v7, %v233_v8  ;;  %v1926_v17 = vrot.slane (!%p166_p9), %v197_v7, %v333_v9  ;;  %v1928_v18 = vrot.slane (!%p166_p9), %v197_v7, %v433_v10 }
  0x14   : > { %v1933_v22 = vrot.slane (!%p166_p9), %v197_v7, %v534_v11  ;;  %v1935_v23 = vrot.slane (!%p166_p9), %v197_v7, %v634_v12  ;;  %v1937_v24 = vrot.slane (!%p166_p9), %v197_v7, %v734_v13  ;;  %v1939_v25 = vrot.slane (!%p166_p9), %v197_v7, %v835_v14 }
  0x15   : > { %s192_s29 = scalar_select %p191_p10, %s1884_s19, 1  ;;  %v1952_v33 = vrot.slane %v197_v7, %v935_v15 }
  0x16   : > { %s2942_s19 = scalar_lea.sflag [#allocation3], %s188_s14 }
  0x17   : > { %s1726_s6 = smul.u32 432, %s192_s29  ;;  %s1389_s29 = sshll.u32 %s2835_s27, 4  ;;  %s2931_s29 = int_to_ptr.vmem [resolvable:$true] %s1389_s29 }
  0x18   : > { %s1770_s7 = scalar_lea.vmem %s2931_s29, 4096 }
  0x19   : > { %s1922_s9 = scalar_lea.vmem %s2983_s0, %s1726_s6  ;;  %s2929_s6 = scalar_lea.hbm %s2987_s4, %s1672_s28 }
  0x1a   : > { %v199_v19 = vld [vmem:[%s1922_s9] sm:$0xff]  ;;  %v200_v20 = vld [vmem:[%s1922_s9 + $0x8] sm:$0xff]  ;;  %v1958_v37 = vld [vmem:[%s1922_s9 + $0x18] sm:$0xff]  ;;  %p1771_p11 = scmp.ne.s32.totalorder %s2931_s29, %s1770_s7 }
  0x1b   : > { %v299_v21 = vld [vmem:[%s1922_s9 + $0x1] sm:$0xff]  ;;  %v235_v27 = vmul.f32 %v1924_v16, %v199_v19  ;;  %v236_v28 = vmul.f32 %v1924_v16, %v200_v20  ;;  %v300_v29 = vld [vmem:[%s1922_s9 + $0x9] sm:$0xff]  ;;  %v1964_v39 = vld [vmem:[%s1922_s9 + $0x19] sm:$0xff]  ;;  %v536_v41 = vmul.f32 %v1958_v37, %v1933_v22 }
  0x1c   : > { %v335_v30 = vmul.f32 %v1926_v17, %v299_v21  ;;  %v399_v31 = vld [vmem:[%s1922_s9 + $0x2] sm:$0xff]  ;;  %v400_v32 = vld [vmem:[%s1922_s9 + $0xa] sm:$0xff]  ;;  %v336_v34 = vmul.f32 %v1926_v17, %v300_v29  ;;  %v636_v44 = vmul.f32 %v1964_v39, %v1935_v23  ;;  %v1976_v45 = vld [vmem:[%s1922_s9 + $0x1a] sm:$0xff]  ;;  %p1772_p12 = pnand %p1771_p11, %p1901_p5 }
  0x1d   : > { %v435_v35 = vmul.f32 %v1928_v18, %v399_v31  ;;  %v436_v36 = vmul.f32 %v1928_v18, %v400_v32  ;;  %v1961_v38 = vld [vmem:[%s1922_s9 + $0x20] sm:$0xff]  ;;  %v736_v49 = vmul.f32 %v1976_v45, %v1937_v24  ;;  %v1988_v51 = vld [vmem:[%s1922_s9 + $0x30] sm:$0xff]  ;;  %v1991_v52 = vld [vmem:[%s1922_s9 + $0x38] sm:$0xff] }
  0x1e   : > { %v367_v40 = vadd.f32 %v335_v30, %v235_v27  ;;  %v537_v42 = vmul.f32 %v1961_v38, %v1933_v22  ;;  %v1971_v43 = vld [vmem:[%s1922_s9 + $0x21] sm:$0xff]  ;;  %v368_v47 = vadd.f32 %v336_v34, %v236_v28  ;;  %v1994_v53 = vld [vmem:[%s1922_s9 + $0x31] sm:$0xff]  ;;  %v837_v55 = vmul.f32 %v1988_v51, %v1939_v25  ;;  %v2001_v57 = vld [vmem:[%s1922_s9 + $0x39] sm:$0xff]  ;;  %p1773_p13 = pneg %p1772_p12 }
  0x1f   : > { %v1979_v46 = vld [vmem:[%s1922_s9 + $0x22] sm:$0xff]  ;;  %v637_v48 = vmul.f32 %v1971_v43, %v1935_v23  ;;  %v838_v56 = vmul.f32 %v1991_v52, %v1939_v25  ;;  %v937_v58 = vmul.f32 %v1994_v53, %v1952_v33  ;;  %v2006_v59 = vld [vmem:[%s1922_s9 + $0x32] sm:$0xff]  ;;  %v2009_v60 = vld [vmem:[%s1922_s9 + $0x3a] sm:$0xff]  ;;  %v938_v62 = vmul.f32 %v2001_v57, %v1952_v33 }
  0x20   : > { %v737_v50 = vmul.f32 %v1979_v46, %v1937_v24  ;;  %v467_v54 = vadd.f32 %v435_v35, %v367_v40  ;;  %v468_v61 = vadd.f32 %v436_v36, %v368_v47  ;;  %v1037_v63 = vmul.f32 %v1944_v26, %v2006_v59  ;;  %v215_v1 = vld [vmem:[%s1922_s9 + $0xc0] sm:$0xff]  ;;  %v216_v2 = vld [vmem:[%s1922_s9 + $0xc8] sm:$0xff]  ;;  %v2032_v15 = vld [vmem:[%s1922_s9 + $0xd8] sm:$0xff] }
  0x21   : > { %v2017_v0 = vmul.f32 %v1944_v26, %v2009_v60  ;;  %v315_v3 = vld [vmem:[%s1922_s9 + $0xc1] sm:$0xff]  ;;  %v251_v5 = vmul.f32 %v1924_v16, %v215_v1  ;;  %v252_v6 = vmul.f32 %v1924_v16, %v216_v2  ;;  %v316_v7 = vld [vmem:[%s1922_s9 + $0xc9] sm:$0xff]  ;;  %v552_v27 = vmul.f32 %v2032_v15, %v1933_v22  ;;  %v2042_v29 = vld [vmem:[%s1922_s9 + $0xd9] sm:$0xff] }
  0x22   : > { %v568_v4 = vadd.f32 %v536_v41, %v467_v54  ;;  %v351_v8 = vmul.f32 %v1926_v17, %v315_v3  ;;  %v415_v9 = vld [vmem:[%s1922_s9 + $0xc2] sm:$0xff]  ;;  %v416_v10 = vld [vmem:[%s1922_s9 + $0xca] sm:$0xff]  ;;  %v569_v11 = vadd.f32 %v537_v42, %v468_v61  ;;  %v352_v12 = vmul.f32 %v1926_v17, %v316_v7  ;;  %v2052_v36 = vld [vmem:[%s1922_s9 + $0xda] sm:$0xff] }
  0x23   : > { %v451_v13 = vmul.f32 %v1928_v18, %v415_v9  ;;  %v452_v14 = vmul.f32 %v1928_v18, %v416_v10  ;;  %v2035_v19 = vld [vmem:[%s1922_s9 + $0xe0] sm:$0xff]  ;;  %v652_v34 = vmul.f32 %v2042_v29, %v1935_v23  ;;  %v2065_v54 = vld [vmem:[%s1922_s9 + $0xf8] sm:$0xff] }
  0x24   : > { %v668_v20 = vadd.f32 %v636_v44, %v568_v4  ;;  %v383_v21 = vadd.f32 %v351_v8, %v251_v5  ;;  %v553_v28 = vmul.f32 %v2035_v19, %v1933_v22  ;;  %v2045_v30 = vld [vmem:[%s1922_s9 + $0xe1] sm:$0xff]  ;;  %v669_v31 = vadd.f32 %v637_v48, %v569_v11  ;;  %v2062_v48 = vld [vmem:[%s1922_s9 + $0xf0] sm:$0xff]  ;;  %v2075_v4 = vld [vmem:[%s1922_s9 + $0xf9] sm:$0xff] }
  0x25   : > { %v384_v32 = vadd.f32 %v352_v12, %v252_v6  ;;  %v653_v35 = vmul.f32 %v2045_v30, %v1935_v23  ;;  %v2055_v40 = vld [vmem:[%s1922_s9 + $0xe2] sm:$0xff]  ;;  %v752_v44 = vmul.f32 %v2052_v36, %v1937_v24  ;;  %v853_v2 = vmul.f32 %v2062_v48, %v1939_v25  ;;  %v2072_v3 = vld [vmem:[%s1922_s9 + $0xf1] sm:$0xff]  ;;  %v2085_v9 = vld [vmem:[%s1922_s9 + $0xfa] sm:$0xff] }
  0x26   : > { %v768_v41 = vadd.f32 %v736_v49, %v668_v20  ;;  %v483_v42 = vadd.f32 %v451_v13, %v383_v21  ;;  %v753_v47 = vmul.f32 %v2055_v40, %v1937_v24  ;;  %v769_v61 = vadd.f32 %v737_v50, %v669_v31  ;;  %v2082_v50 = vld [vmem:[%s1922_s9 + $0xf2] sm:$0xff] }
  0x27   : > { %v484_v1 = vadd.f32 %v452_v14, %v384_v32  ;;  %v854_v49 = vmul.f32 %v2065_v54, %v1939_v25  ;;  %v953_v7 = vmul.f32 %v2072_v3, %v1952_v33  ;;  %v954_v8 = vmul.f32 %v2075_v4, %v1952_v33 }
  0x28   : > { %v869_v5 = vadd.f32 %v837_v55, %v768_v41  ;;  %v584_v6 = vadd.f32 %v552_v27, %v483_v42  ;;  %v870_v10 = vadd.f32 %v838_v56, %v769_v61  ;;  %v1053_v12 = vmul.f32 %v1944_v26, %v2082_v50 }
  0x29   : > { %v585_v11 = vadd.f32 %v553_v28, %v484_v1  ;;  %v1054_v13 = vmul.f32 %v1944_v26, %v2085_v9  ;;  %v237_v20 = vmul.f32 %v1958_v37, %v1924_v16  ;;  %v238_v21 = vmul.f32 %v1961_v38, %v1924_v16 }
  0x2a   : > { %v969_v55 = vadd.f32 %v937_v58, %v869_v5  ;;  %v684_v14 = vadd.f32 %v652_v34, %v584_v6  ;;  %v970_v27 = vadd.f32 %v938_v62, %v870_v10  ;;  %v337_v56 = vmul.f32 %v1964_v39, %v1926_v17  ;;  %v2117_v5 = vld [vmem:[%s1922_s9 + $0x48] sm:$0xff] }
  0x2b   : > { %v685_v31 = vadd.f32 %v653_v35, %v585_v11  ;;  %v338_v28 = vmul.f32 %v1971_v43, %v1926_v17  ;;  %v437_v58 = vmul.f32 %v1976_v45, %v1928_v18  ;;  %v438_v34 = vmul.f32 %v1979_v46, %v1928_v18  ;;  %v2121_v11 = vld [vmem:[%s1922_s9 + $0x50] sm:$0xff] }
  0x2c   : > { %v1069_v32 = vadd.f32 %v1037_v63, %v969_v55  ;;  %v784_v41 = vadd.f32 %v752_v44, %v684_v14  ;;  %v1070_v37 = vadd.f32 %v2017_v0, %v970_v27  ;;  %v369_v62 = vadd.f32 %v337_v56, %v237_v20  ;;  %v2126_v55 = vld [vmem:[%s1922_s9 + $0x49] sm:$0xff]  ;;  %v2129_v14 = vld [vmem:[%s1922_s9 + $0x51] sm:$0xff] }
  0x2d   : > { %v785_v38 = vadd.f32 %v753_v47, %v685_v31  ;;  %v370_v35 = vadd.f32 %v338_v28, %v238_v21  ;;  %v538_v39 = vmul.f32 %v1988_v51, %v1933_v22  ;;  %v539_v43 = vmul.f32 %v1991_v52, %v1933_v22  ;;  %v2138_v31 = vld [vmem:[%s1922_s9 + $0x4a] sm:$0xff] }
  0x2e   : > { %v885_v42 = vadd.f32 %v853_v2, %v784_v41  ;;  %v638_v45 = vmul.f32 %v1994_v53, %v1935_v23  ;;  %v1101_v63 = vpack.c.bf16 %v1070_v37, %v1069_v32  ;;  %v469_v0 = vadd.f32 %v437_v58, %v369_v62  ;;  %v2141_v41 = vld [vmem:[%s1922_s9 + $0x52] sm:$0xff] }
  0x2f   : > { %v886_v46 = vadd.f32 %v854_v49, %v785_v38  ;;  %v470_v44 = vadd.f32 %v438_v34, %v370_v35  ;;  %v639_v61 = vmul.f32 %v2001_v57, %v1935_v23  ;;  %v738_v1 = vmul.f32 %v2006_v59, %v1937_v24 }
  0x30   : > { %v985_v47 = vadd.f32 %v953_v7, %v885_v42  ;;  %v739_v2 = vmul.f32 %v2009_v60, %v1937_v24  ;;  %1692 = vmatprep.mubr.msk.bf16.mxu0 %vm1125_vm2, %v1101_v63  ;;  %v570_v49 = vadd.f32 %v538_v39, %v469_v0  ;;  %v839_v7 = vmul.f32 %v2117_v5, %v1939_v25 }
  0x31   : > { %v986_v6 = vadd.f32 %v954_v8, %v886_v46  ;;  %v571_v10 = vadd.f32 %v539_v43, %v470_v44  ;;  %v840_v21 = vmul.f32 %v2121_v11, %v1939_v25  ;;  %v939_v27 = vmul.f32 %v2126_v55, %v1952_v33 }
  0x32   : > { %v1085_v20 = vadd.f32 %v1053_v12, %v985_v47  ;;  %v940_v8 = vmul.f32 %v2129_v14, %v1952_v33  ;;  %v670_v28 = vadd.f32 %v638_v45, %v570_v49  ;;  %v1039_v58 = vmul.f32 %v1944_v26, %v2138_v31 }
  0x33   : > { %v1086_v56 = vadd.f32 %v1054_v13, %v986_v6  ;;  %v671_v32 = vadd.f32 %v639_v61, %v571_v10  ;;  %v1040_v12 = vmul.f32 %v1944_v26, %v2141_v41  ;;  %v253_v34 = vmul.f32 %v2032_v15, %v1924_v16 }
  0x34   : > { %v254_v37 = vmul.f32 %v2035_v19, %v1924_v16  ;;  %v353_v38 = vmul.f32 %v2042_v29, %v1926_v17  ;;  %v770_v62 = vadd.f32 %v738_v1, %v670_v28  ;;  %v354_v42 = vmul.f32 %v2045_v30, %v1926_v17  ;;  %v2171_v1 = vld [vmem:[%s1922_s9 + $0x108] sm:$0xff] }
  0x35   : > { %v1109_v13 = vpack.c.bf16 %v1086_v56, %v1085_v20  ;;  %v771_v35 = vadd.f32 %v739_v2, %v671_v32  ;;  %v453_v43 = vmul.f32 %v2052_v36, %v1928_v18  ;;  %v454_v15 = vmul.f32 %v2055_v40, %v1928_v18  ;;  %v2174_v2 = vld [vmem:[%s1922_s9 + $0x110] sm:$0xff] }
  0x36   : > { %v385_v39 = vadd.f32 %v353_v38, %v253_v34  ;;  %v554_v19 = vmul.f32 %v2062_v48, %v1933_v22  ;;  %v871_v29 = vadd.f32 %v839_v7, %v770_v62  ;;  %v386_v63 = vadd.f32 %v354_v42, %v254_v37  ;;  %v2183_v20 = vld [vmem:[%s1922_s9 + $0x109] sm:$0xff]  ;;  %v2186_v56 = vld [vmem:[%s1922_s9 + $0x111] sm:$0xff] }
  0x37   : > { %1708 = vmatprep.mubr.msk.bf16.mxu1 %vm1125_vm2, %v1109_v13  ;;  %v872_v45 = vadd.f32 %v840_v21, %v771_v35  ;;  %v555_v30 = vmul.f32 %v2065_v54, %v1933_v22  ;;  %v654_v36 = vmul.f32 %v2072_v3, %v1935_v23  ;;  %v655_v40 = vmul.f32 %v2075_v4, %v1935_v23  ;;  %v2191_v32 = vld [vmem:[%s1922_s9 + $0x10a] sm:$0xff] }
  0x38   : > { %v485_v46 = vadd.f32 %v453_v43, %v385_v39  ;;  %v971_v0 = vadd.f32 %v939_v27, %v871_v29  ;;  %v486_v47 = vadd.f32 %v454_v15, %v386_v63  ;;  %v754_v61 = vmul.f32 %v2082_v50, %v1937_v24  ;;  %v2204_v39 = vld [vmem:[%s1922_s9 + $0x112] sm:$0xff] }
  0x39   : > { %v972_v44 = vadd.f32 %v940_v8, %v872_v45  ;;  %v755_v49 = vmul.f32 %v2085_v9, %v1937_v24  ;;  %v855_v10 = vmul.f32 %v2171_v1, %v1939_v25  ;;  %v856_v7 = vmul.f32 %v2174_v2, %v1939_v25 }
  0x3a   : > { %v586_v6 = vadd.f32 %v554_v19, %v485_v46  ;;  %v1071_v21 = vadd.f32 %v1039_v58, %v971_v0  ;;  %v587_v8 = vadd.f32 %v555_v30, %v486_v47  ;;  %v955_v28 = vmul.f32 %v2183_v20, %v1952_v33 }
  0x3b   : > { %v1072_v27 = vadd.f32 %v1040_v12, %v972_v44  ;;  %v956_v37 = vmul.f32 %v2186_v56, %v1952_v33  ;;  %v1055_v38 = vmul.f32 %v1944_v26, %v2191_v32  ;;  %v239_v13 = vmul.f32 %v1988_v51, %v1924_v16 }
  0x3c   : > { %v686_v34 = vadd.f32 %v654_v36, %v586_v6  ;;  %v687_v12 = vadd.f32 %v655_v40, %v587_v8  ;;  %v240_v62 = vmul.f32 %v1991_v52, %v1924_v16  ;;  %v339_v35 = vmul.f32 %v1994_v53, %v1926_v17  ;;  %v2226_v40 = vld [vmem:[%s1922_s9 + $0x60] sm:$0xff] }
  0x3d   : > { %v1102_v58 = vpack.c.bf16 %v1072_v27, %v1071_v21  ;;  %v340_v43 = vmul.f32 %v2001_v57, %v1926_v17  ;;  %v439_v15 = vmul.f32 %v2006_v59, %v1928_v18  ;;  %v440_v51 = vmul.f32 %v2009_v60, %v1928_v18  ;;  %v2241_v27 = vld [vmem:[%s1922_s9 + $0x69] sm:$0xff] }
  0x3e   : > { %v786_v42 = vadd.f32 %v754_v61, %v686_v34  ;;  %v787_v19 = vadd.f32 %v755_v49, %v687_v12  ;;  %v1056_v52 = vmul.f32 %v1944_v26, %v2204_v39  ;;  %v371_v53 = vadd.f32 %v339_v35, %v239_v13  ;;  %v2231_v61 = vld [vmem:[%s1922_s9 + $0x68] sm:$0xff] }
  0x3f   : > { %1693 = vmatmul.mubr.msk.bf16.vlgmr.msra.gmra.mrb[0].mxu0 %vm1125_vm2, %v1102_v58  ;;  %v540_v29 = vmul.f32 %v2117_v5, %v1933_v22  ;;  %v372_v45 = vadd.f32 %v340_v43, %v240_v62  ;;  %v541_v59 = vmul.f32 %v2121_v11, %v1933_v22  ;;  %v640_v60 = vmul.f32 %v2126_v55, %v1935_v23  ;;  %v2236_v49 = vld [vmem:[%s1922_s9 + $0x61] sm:$0xff] }
  0x40   : > { %v887_v57 = vadd.f32 %v855_v10, %v786_v42  ;;  %v888_v63 = vadd.f32 %v856_v7, %v787_v19  ;;  %v471_v30 = vadd.f32 %v439_v15, %v371_v53  ;;  %v641_v46 = vmul.f32 %v2129_v14, %v1935_v23 }
  0x41   : > { %v740_v36 = vmul.f32 %v2138_v31, %v1937_v24  ;;  %v472_v44 = vadd.f32 %v440_v51, %v372_v45  ;;  %v741_v47 = vmul.f32 %v2141_v41, %v1937_v24  ;;  %v841_v6 = vmul.f32 %v2226_v40, %v1939_v25 }
  0x42   : > { %v987_v0 = vadd.f32 %v955_v28, %v887_v57  ;;  %v988_v10 = vadd.f32 %v956_v37, %v888_v63  ;;  %v572_v7 = vadd.f32 %v540_v29, %v471_v30  ;;  %v842_v21 = vmul.f32 %v2231_v61, %v1939_v25  ;;  %v2246_v28 = vld [vmem:[%s1922_s9 + $0x62] sm:$0xff]  ;;  %v2267_v29 = vld [vmem:[%s1922_s9 + $0x6a] sm:$0xff] }
  0x43   : > { %v941_v8 = vmul.f32 %v2236_v49, %v1952_v33  ;;  %v573_v13 = vadd.f32 %v541_v59, %v472_v44  ;;  %v942_v58 = vmul.f32 %v2241_v27, %v1952_v33  ;;  %v1041_v37 = vmul.f32 %v1944_v26, %v2246_v28 }
  0x44   : > { %v1087_v34 = vadd.f32 %v1055_v38, %v987_v0  ;;  %v1088_v12 = vadd.f32 %v1056_v52, %v988_v10  ;;  %v672_v62 = vadd.f32 %v640_v60, %v572_v7  ;;  %v255_v35 = vmul.f32 %v2062_v48, %v1924_v16  ;;  %v2284_v0 = vld [vmem:[%s1922_s9 + $0x128] sm:$0xff] }
  0x45   : > { %v256_v42 = vmul.f32 %v2065_v54, %v1924_v16  ;;  %v673_v43 = vadd.f32 %v641_v46, %v573_v13  ;;  %v355_v38 = vmul.f32 %v2072_v3, %v1926_v17  ;;  %v356_v15 = vmul.f32 %v2075_v4, %v1926_v17  ;;  %v2293_v7 = vld [vmem:[%s1922_s9 + $0x121] sm:$0xff] }
  0x46   : > { %v455_v51 = vmul.f32 %v2082_v50, %v1928_v18  ;;  %v1110_v19 = vpack.c.bf16 %v1088_v12, %v1087_v34  ;;  %v772_v53 = vadd.f32 %v740_v36, %v672_v62  ;;  %v456_v52 = vmul.f32 %v2085_v9, %v1928_v18  ;;  %v2281_v36 = vld [vmem:[%s1922_s9 + $0x120] sm:$0xff]  ;;  %v2296_v12 = vld [vmem:[%s1922_s9 + $0x129] sm:$0xff] }
  0x47   : > { %v556_v48 = vmul.f32 %v2171_v1, %v1933_v22  ;;  %v773_v54 = vadd.f32 %v741_v47, %v673_v43  ;;  %v387_v3 = vadd.f32 %v355_v38, %v255_v35  ;;  %v388_v57 = vadd.f32 %v356_v15, %v256_v42  ;;  %v2301_v62 = vld [vmem:[%s1922_s9 + $0x122] sm:$0xff] }
  0x48   : > { %v557_v4 = vmul.f32 %v2174_v2, %v1933_v22  ;;  %1709 = vmatmul.mubr.msk.bf16.vlgmr.msra.gmra.mrb[0].mxu1 %vm1125_vm2, %v1110_v19  ;;  %v873_v50 = vadd.f32 %v841_v6, %v772_v53  ;;  %v1042_v9 = vmul.f32 %v1944_v26, %v2267_v29  ;;  %v656_v45 = vmul.f32 %v2183_v20, %v1935_v23  ;;  %v2312_v53 = vld [vmem:[%s1922_s9 + $0x12a] sm:$0xff] }
  0x49   : > { %v657_v59 = vmul.f32 %v2186_v56, %v1935_v23  ;;  %v874_v60 = vadd.f32 %v842_v21, %v773_v54  ;;  %v487_v63 = vadd.f32 %v455_v51, %v387_v3  ;;  %v488_v30 = vadd.f32 %v456_v52, %v388_v57 }
  0x4a   : > { %v756_v46 = vmul.f32 %v2191_v32, %v1937_v24  ;;  %v973_v44 = vadd.f32 %v941_v8, %v873_v50  ;;  %v757_v47 = vmul.f32 %v2204_v39, %v1937_v24  ;;  %v857_v6 = vmul.f32 %v2281_v36, %v1939_v25 }
  0x4b   : > { %v858_v10 = vmul.f32 %v2284_v0, %v1939_v25  ;;  %v974_v21 = vadd.f32 %v942_v58, %v874_v60  ;;  %v588_v34 = vadd.f32 %v556_v48, %v487_v63  ;;  %v589_v13 = vadd.f32 %v557_v4, %v488_v30 }
  0x4c   : > { %v957_v8 = vmul.f32 %v2293_v7, %v1952_v33  ;;  %v1073_v35 = vadd.f32 %v1041_v37, %v973_v44  ;;  %v958_v42 = vmul.f32 %v2296_v12, %v1952_v33  ;;  %v1057_v43 = vmul.f32 %v1944_v26, %v2301_v62  ;;  %v2341_v44 = vld [vmem:[%s1922_s9 + $0x80] sm:$0xff] }
  0x4d   : > { %v241_v38 = vmul.f32 %v2117_v5, %v1924_v16  ;;  %v1074_v58 = vadd.f32 %v1042_v9, %v974_v21  ;;  %v688_v15 = vadd.f32 %v656_v45, %v588_v34  ;;  %v689_v51 = vadd.f32 %v657_v59, %v589_v13  ;;  %v2348_v34 = vld [vmem:[%s1922_s9 + $0x79] sm:$0xff]  ;;  %v2351_v13 = vld [vmem:[%s1922_s9 + $0x81] sm:$0xff] }
  0x4e   : > { %v242_v19 = vmul.f32 %v2121_v11, %v1924_v16  ;;  %v341_v37 = vmul.f32 %v2126_v55, %v1926_v17  ;;  %v342_v52 = vmul.f32 %v2129_v14, %v1926_v17  ;;  %v441_v48 = vmul.f32 %v2138_v31, %v1928_v18 }
  0x4f   : > { %v442_v5 = vmul.f32 %v2141_v41, %v1928_v18  ;;  %v1103_v54 = vpack.c.bf16 %v1074_v58, %v1073_v35  ;;  %v788_v3 = vadd.f32 %v756_v46, %v688_v15  ;;  %v789_v57 = vadd.f32 %v757_v47, %v689_v51  ;;  %v2338_v46 = vld [vmem:[%s1922_s9 + $0x78] sm:$0xff] }
  0x50   : > { %v1058_v11 = vmul.f32 %v1944_v26, %v2312_v53  ;;  %v373_v4 = vadd.f32 %v341_v37, %v241_v38  ;;  %v374_v50 = vadd.f32 %v342_v52, %v242_v19  ;;  %v542_v55 = vmul.f32 %v2226_v40, %v1933_v22 }
  0x51   : > { %v543_v14 = vmul.f32 %v2231_v61, %v1933_v22  ;;  %1696 = vmatprep.mubr.msk.bf16.mxu0 %vm1125_vm2, %v1103_v54  ;;  %v889_v31 = vadd.f32 %v857_v6, %v788_v3  ;;  %v890_v41 = vadd.f32 %v858_v10, %v789_v57  ;;  %v642_v9 = vmul.f32 %v2236_v49, %v1935_v23 }
  0x52   : > { %v643_v45 = vmul.f32 %v2241_v27, %v1935_v23  ;;  %v473_v59 = vadd.f32 %v441_v48, %v373_v4  ;;  %v474_v60 = vadd.f32 %v442_v5, %v374_v50  ;;  %v742_v63 = vmul.f32 %v2246_v28, %v1937_v24  ;;  %v2375_v50 = vld [vmem:[%s1922_s9 + $0x82] sm:$0xff] }
  0x53   : > { %v743_v30 = vmul.f32 %v2267_v29, %v1937_v24  ;;  %v989_v47 = vadd.f32 %v957_v8, %v889_v31  ;;  %v990_v6 = vadd.f32 %v958_v42, %v890_v41  ;;  %v843_v10 = vmul.f32 %v2338_v46, %v1939_v25  ;;  %v2358_v8 = vld [vmem:[%s1922_s9 + $0x7a] sm:$0xff] }
  0x54   : > { %v844_v21 = vmul.f32 %v2341_v44, %v1939_v25  ;;  %v574_v35 = vadd.f32 %v542_v55, %v473_v59  ;;  %v575_v38 = vadd.f32 %v543_v14, %v474_v60  ;;  %v943_v58 = vmul.f32 %v2348_v34, %v1952_v33 }
  0x55   : > { %v944_v15 = vmul.f32 %v2351_v13, %v1952_v33  ;;  %v1089_v42 = vadd.f32 %v1057_v43, %v989_v47  ;;  %v1090_v51 = vadd.f32 %v1058_v11, %v990_v6  ;;  %v1043_v19 = vmul.f32 %v1944_v26, %v2358_v8 }
  0x56   : > { %v257_v37 = vmul.f32 %v2171_v1, %v1924_v16  ;;  %v674_v52 = vadd.f32 %v642_v9, %v574_v35  ;;  %v675_v48 = vadd.f32 %v643_v45, %v575_v38  ;;  %v258_v5 = vmul.f32 %v2174_v2, %v1924_v16  ;;  %v2389_v45 = vld [vmem:[%s1922_s9 + $0x138] sm:$0xff] }
  0x57   : > { %v357_v54 = vmul.f32 %v2183_v20, %v1926_v17  ;;  %v1111_v3 = vpack.c.bf16 %v1090_v51, %v1089_v42  ;;  %v358_v57 = vmul.f32 %v2186_v56, %v1926_v17  ;;  %v457_v43 = vmul.f32 %v2191_v32, %v1928_v18  ;;  %v2403_v38 = vld [vmem:[%s1922_s9 + $0x139] sm:$0xff]  ;;  %v2406_v42 = vld [vmem:[%s1922_s9 + $0x141] sm:$0xff] }
  0x58   : > { %v458_v11 = vmul.f32 %v2204_v39, %v1928_v18  ;;  %v774_v1 = vadd.f32 %v742_v63, %v674_v52  ;;  %v775_v4 = vadd.f32 %v743_v30, %v675_v48  ;;  %v558_v20 = vmul.f32 %v2281_v36, %v1933_v22  ;;  %v2396_v30 = vld [vmem:[%s1922_s9 + $0x140] sm:$0xff] }
  0x59   : > { %v389_v2 = vadd.f32 %v357_v54, %v257_v37  ;;  %1712 = vmatprep.mubr.msk.bf16.mxu1 %vm1125_vm2, %v1111_v3  ;;  %v1044_v56 = vmul.f32 %v1944_v26, %v2375_v50  ;;  %v390_v55 = vadd.f32 %v358_v57, %v258_v5  ;;  %v559_v32 = vmul.f32 %v2284_v0, %v1933_v22  ;;  %v2409_v51 = vld [vmem:[%s1922_s9 + $0x13a] sm:$0xff] }
  0x5a   : > { %v658_v39 = vmul.f32 %v2293_v7, %v1935_v23  ;;  %v875_v14 = vadd.f32 %v843_v10, %v774_v1  ;;  %v876_v31 = vadd.f32 %v844_v21, %v775_v4  ;;  %v659_v9 = vmul.f32 %v2296_v12, %v1935_v23 }
  0x5b   : > { %v489_v41 = vadd.f32 %v457_v43, %v389_v2  ;;  %v490_v59 = vadd.f32 %v458_v11, %v390_v55  ;;  %v758_v60 = vmul.f32 %v2301_v62, %v1937_v24  ;;  %v759_v63 = vmul.f32 %v2312_v53, %v1937_v24 }
  0x5c   : > { %v859_v47 = vmul.f32 %v2389_v45, %v1939_v25  ;;  %v975_v6 = vadd.f32 %v943_v58, %v875_v14  ;;  %v976_v10 = vadd.f32 %v944_v15, %v876_v31  ;;  %v860_v35 = vmul.f32 %v2396_v30, %v1939_v25 }
  0x5d   : > { %v590_v21 = vadd.f32 %v558_v20, %v489_v41  ;;  %v591_v37 = vadd.f32 %v559_v32, %v490_v59  ;;  %v959_v52 = vmul.f32 %v2403_v38, %v1952_v33  ;;  %v960_v48 = vmul.f32 %v2406_v42, %v1952_v33 }
  0x5e   : > { %v1059_v58 = vmul.f32 %v1944_v26, %v2409_v51  ;;  %v1075_v15 = vadd.f32 %v1043_v19, %v975_v6  ;;  %v1076_v5 = vadd.f32 %v1044_v56, %v976_v10  ;;  %v243_v3 = vmul.f32 %v2226_v40, %v1924_v16  ;;  %v2430_v56 = vld [vmem:[%s1922_s9 + $0x142] sm:$0xff] }
  0x5f   : > { %v690_v54 = vadd.f32 %v658_v39, %v590_v21  ;;  %v691_v57 = vadd.f32 %v659_v9, %v591_v37  ;;  %v244_v43 = vmul.f32 %v2231_v61, %v1924_v16  ;;  %v343_v11 = vmul.f32 %v2236_v49, %v1926_v17  ;;  %v2444_v9 = vld [vmem:[%s1922_s9 + $0x90] sm:$0xff] }
  0x60   : > { %v344_v1 = vmul.f32 %v2241_v27, %v1926_v17  ;;  %v1104_v4 = vpack.c.bf16 %v1076_v5, %v1075_v15  ;;  %v443_v19 = vmul.f32 %v2246_v28, %v1928_v18  ;;  %v444_v20 = vmul.f32 %v2267_v29, %v1928_v18  ;;  %v2458_v15 = vld [vmem:[%s1922_s9 + $0x91] sm:$0xff] }
  0x61   : > { %v790_v2 = vadd.f32 %v758_v60, %v690_v54  ;;  %v791_v40 = vadd.f32 %v759_v63, %v691_v57  ;;  %v375_v55 = vadd.f32 %v343_v11, %v243_v3  ;;  %v544_v49 = vmul.f32 %v2338_v46, %v1933_v22  ;;  %v2464_v5 = vld [vmem:[%s1922_s9 + $0x92] sm:$0xff] }
  0x62   : > { %v376_v61 = vadd.f32 %v344_v1, %v244_v43  ;;  %1697 = vmatmul.mubr.msk.bf16.gmra.mrb[4].mxu0 %vm1125_vm2, %v1104_v4  ;;  %v1060_v32 = vmul.f32 %v1944_v26, %v2430_v56  ;;  %v545_v28 = vmul.f32 %v2341_v44, %v1933_v22  ;;  %v644_v29 = vmul.f32 %v2348_v34, %v1935_v23 }
  0x63   : > { %v891_v27 = vadd.f32 %v859_v47, %v790_v2  ;;  %v892_v39 = vadd.f32 %v860_v35, %v791_v40  ;;  %v475_v14 = vadd.f32 %v443_v19, %v375_v55  ;;  %v645_v41 = vmul.f32 %v2351_v13, %v1935_v23  ;;  %v2451_v47 = vld [vmem:[%s1922_s9 + $0x98] sm:$0xff] }
  0x64   : > { %v476_v31 = vadd.f32 %v444_v20, %v376_v61  ;;  %v744_v60 = vmul.f32 %v2358_v8, %v1937_v24  ;;  %v745_v63 = vmul.f32 %v2375_v50, %v1937_v24  ;;  %v845_v6 = vmul.f32 %v2444_v9, %v1939_v25 }
  0x65   : > { %v991_v59 = vadd.f32 %v959_v52, %v891_v27  ;;  %v992_v10 = vadd.f32 %v960_v48, %v892_v39  ;;  %v576_v21 = vadd.f32 %v544_v49, %v475_v14  ;;  %v846_v37 = vmul.f32 %v2451_v47, %v1939_v25  ;;  %v2461_v52 = vld [vmem:[%s1922_s9 + $0x99] sm:$0xff] }
  0x66   : > { %v577_v35 = vadd.f32 %v545_v28, %v476_v31  ;;  %v945_v3 = vmul.f32 %v2458_v15, %v1952_v33  ;;  %v946_v57 = vmul.f32 %v2461_v52, %v1952_v33  ;;  %v1045_v48 = vmul.f32 %v1944_v26, %v2464_v5 }
  0x67   : > { %v1091_v54 = vadd.f32 %v1059_v58, %v991_v59  ;;  %v1092_v43 = vadd.f32 %v1060_v32, %v992_v10  ;;  %v676_v11 = vadd.f32 %v644_v29, %v576_v21  ;;  %v259_v4 = vmul.f32 %v2281_v36, %v1924_v16  ;;  %v2485_v36 = vld [vmem:[%s1922_s9 + $0x9a] sm:$0xff]  ;;  %v2511_v21 = vld [vmem:[%s1922_s9 + $0x151] sm:$0xff] }
  0x68   : > { %v677_v1 = vadd.f32 %v645_v41, %v577_v35  ;;  %v260_v2 = vmul.f32 %v2284_v0, %v1924_v16  ;;  %v359_v58 = vmul.f32 %v2293_v7, %v1926_v17  ;;  %v360_v19 = vmul.f32 %v2296_v12, %v1926_v17  ;;  %v2501_v41 = vld [vmem:[%s1922_s9 + $0x150] sm:$0xff] }
  0x69   : > { %v459_v20 = vmul.f32 %v2301_v62, %v1928_v18  ;;  %v1112_v40 = vpack.c.bf16 %v1092_v43, %v1091_v54  ;;  %v776_v55 = vadd.f32 %v744_v60, %v676_v11  ;;  %v460_v49 = vmul.f32 %v2312_v53, %v1928_v18  ;;  %v2516_v43 = vld [vmem:[%s1922_s9 + $0x159] sm:$0xff] }
  0x6a   : > { %v777_v61 = vadd.f32 %v745_v63, %v677_v1  ;;  %v391_v27 = vadd.f32 %v359_v58, %v259_v4  ;;  %v392_v0 = vadd.f32 %v360_v19, %v260_v2  ;;  %v560_v7 = vmul.f32 %v2389_v45, %v1933_v22 }
  0x6b   : > { %v561_v12 = vmul.f32 %v2396_v30, %v1933_v22  ;;  %1713 = vmatmul.mubr.msk.bf16.gmra.mrb[4].mxu1 %vm1125_vm2, %v1112_v40  ;;  %v877_v62 = vadd.f32 %v845_v6, %v776_v55  ;;  %v1046_v28 = vmul.f32 %v1944_v26, %v2485_v36  ;;  %v660_v53 = vmul.f32 %v2403_v38, %v1935_v23  ;;  %v2506_v6 = vld [vmem:[%s1922_s9 + $0x158] sm:$0xff] }
  0x6c   : > { %v878_v32 = vadd.f32 %v846_v37, %v777_v61  ;;  %v491_v29 = vadd.f32 %v459_v20, %v391_v27  ;;  %v492_v39 = vadd.f32 %v460_v49, %v392_v0  ;;  %v661_v14 = vmul.f32 %v2406_v42, %v1935_v23  ;;  %v2532_v61 = vld [vmem:[%s1922_s9 + $0x15a] sm:$0xff] }
  0x6d   : > { %v760_v31 = vmul.f32 %v2409_v51, %v1937_v24  ;;  %v977_v59 = vadd.f32 %v945_v3, %v877_v62  ;;  %v761_v63 = vmul.f32 %v2430_v56, %v1937_v24  ;;  %v861_v10 = vmul.f32 %v2501_v41, %v1939_v25 }
  0x6e   : > { %v978_v60 = vadd.f32 %v946_v57, %v878_v32  ;;  %v592_v35 = vadd.f32 %v560_v7, %v491_v29  ;;  %v593_v37 = vadd.f32 %v561_v12, %v492_v39  ;;  %v862_v54 = vmul.f32 %v2506_v6, %v1939_v25  ;;  %v2521_v57 = vld [vmem:[%s1922_s9 + $0x152] sm:$0xff] }
  0x6f   : > { %v961_v3 = vmul.f32 %v2511_v21, %v1952_v33  ;;  %v1077_v11 = vadd.f32 %v1045_v48, %v977_v59  ;;  %v962_v4 = vmul.f32 %v2516_v43, %v1952_v33  ;;  %v1061_v2 = vmul.f32 %v1944_v26, %v2521_v57  ;;  %v2561_v59 = vld [vmem:[%s1922_s9 + $0xb0] sm:$0xff] }
  0x70   : > { %v1078_v1 = vadd.f32 %v1046_v28, %v978_v60  ;;  %v692_v58 = vadd.f32 %v660_v53, %v592_v35  ;;  %v693_v19 = vadd.f32 %v661_v14, %v593_v37  ;;  %v245_v20 = vmul.f32 %v2338_v46, %v1924_v16  ;;  %v2568_v37 = vld [vmem:[%s1922_s9 + $0xa9] sm:$0xff] }
  0x71   : > { %v246_v40 = vmul.f32 %v2341_v44, %v1924_v16  ;;  %v345_v48 = vmul.f32 %v2348_v34, %v1926_v17  ;;  %v346_v49 = vmul.f32 %v2351_v13, %v1926_v17  ;;  %v445_v27 = vmul.f32 %v2358_v8, %v1928_v18 }
  0x72   : > { %v1105_v55 = vpack.c.bf16 %v1078_v1, %v1077_v11  ;;  %v792_v0 = vadd.f32 %v760_v31, %v692_v58  ;;  %v793_v7 = vadd.f32 %v761_v63, %v693_v19  ;;  %v1062_v46 = vmul.f32 %v1944_v26, %v2532_v61  ;;  %v2558_v31 = vld [vmem:[%s1922_s9 + $0xa8] sm:$0xff] }
  0x73   : > { %v446_v44 = vmul.f32 %v2375_v50, %v1928_v18  ;;  %v377_v12 = vadd.f32 %v345_v48, %v245_v20  ;;  %v378_v34 = vadd.f32 %v346_v49, %v246_v40  ;;  %v546_v13 = vmul.f32 %v2444_v9, %v1933_v22 }
  0x74   : > { %1700 = vmatprep.mubr.msk.bf16.mxu0 %vm1125_vm2, %v1105_v55  ;;  %v547_v8 = vmul.f32 %v2451_v47, %v1933_v22  ;;  %v893_v62 = vadd.f32 %v861_v10, %v792_v0  ;;  %v894_v32 = vadd.f32 %v862_v54, %v793_v7  ;;  %v646_v28 = vmul.f32 %v2458_v15, %v1935_v23  ;;  %v2571_v54 = vld [vmem:[%s1922_s9 + $0xb1] sm:$0xff] }
  0x75   : > { %v647_v50 = vmul.f32 %v2461_v52, %v1935_v23  ;;  %v477_v53 = vadd.f32 %v445_v27, %v377_v12  ;;  %v478_v29 = vadd.f32 %v446_v44, %v378_v34  ;;  %v746_v39 = vmul.f32 %v2464_v5, %v1937_v24  ;;  %v2595_v34 = vld [vmem:[%s1922_s9 + $0xb2] sm:$0xff] }
  0x76   : > { %v747_v14 = vmul.f32 %v2485_v36, %v1937_v24  ;;  %v993_v60 = vadd.f32 %v961_v3, %v893_v62  ;;  %v994_v63 = vadd.f32 %v962_v4, %v894_v32  ;;  %v847_v10 = vmul.f32 %v2558_v31, %v1939_v25  ;;  %v2578_v3 = vld [vmem:[%s1922_s9 + $0xaa] sm:$0xff] }
  0x77   : > { %v848_v35 = vmul.f32 %v2561_v59, %v1939_v25  ;;  %v578_v11 = vadd.f32 %v546_v13, %v477_v53  ;;  %v579_v1 = vadd.f32 %v547_v8, %v478_v29  ;;  %v947_v58 = vmul.f32 %v2568_v37, %v1952_v33 }
  0x78   : > { %v948_v19 = vmul.f32 %v2571_v54, %v1952_v33  ;;  %v1093_v4 = vadd.f32 %v1061_v2, %v993_v60  ;;  %v1094_v20 = vadd.f32 %v1062_v46, %v994_v63  ;;  %v1047_v40 = vmul.f32 %v1944_v26, %v2578_v3 }
  0x79   : > { %v261_v55 = vmul.f32 %v2389_v45, %v1924_v16  ;;  %v678_v48 = vadd.f32 %v646_v28, %v578_v11  ;;  %v679_v49 = vadd.f32 %v647_v50, %v579_v1  ;;  %v262_v27 = vmul.f32 %v2396_v30, %v1924_v16  ;;  %v2609_v50 = vld [vmem:[%s1922_s9 + $0x168] sm:$0xff] }
  0x7a   : > { %v361_v0 = vmul.f32 %v2403_v38, %v1926_v17  ;;  %v1113_v7 = vpack.c.bf16 %v1094_v20, %v1093_v4  ;;  %v362_v44 = vmul.f32 %v2406_v42, %v1926_v17  ;;  %v461_v2 = vmul.f32 %v2409_v51, %v1928_v18  ;;  %v2623_v1 = vld [vmem:[%s1922_s9 + $0x169] sm:$0xff]  ;;  %v2626_v4 = vld [vmem:[%s1922_s9 + $0x171] sm:$0xff] }
  0x7b   : > { %v462_v46 = vmul.f32 %v2430_v56, %v1928_v18  ;;  %v778_v45 = vadd.f32 %v746_v39, %v678_v48  ;;  %v779_v12 = vadd.f32 %v747_v14, %v679_v49  ;;  %v562_v38 = vmul.f32 %v2501_v41, %v1933_v22  ;;  %v2616_v14 = vld [vmem:[%s1922_s9 + $0x170] sm:$0xff] }
  0x7c   : > { %v393_v30 = vadd.f32 %v361_v0, %v261_v55  ;;  %1716 = vmatprep.mubr.msk.bf16.mxu1 %vm1125_vm2, %v1113_v7  ;;  %v1048_v42 = vmul.f32 %v1944_v26, %v2595_v34  ;;  %v394_v13 = vadd.f32 %v362_v44, %v262_v27  ;;  %v563_v51 = vmul.f32 %v2506_v6, %v1933_v22  ;;  %v2629_v20 = vld [vmem:[%s1922_s9 + $0x16a] sm:$0xff] }
  0x7d   : > { %v662_v56 = vmul.f32 %v2511_v21, %v1935_v23  ;;  %v879_v8 = vadd.f32 %v847_v10, %v778_v45  ;;  %v880_v62 = vadd.f32 %v848_v35, %v779_v12  ;;  %v663_v28 = vmul.f32 %v2516_v43, %v1935_v23 }
  0x7e   : > { %v493_v32 = vadd.f32 %v461_v2, %v393_v30  ;;  %v494_v53 = vadd.f32 %v462_v46, %v394_v13  ;;  %v762_v29 = vmul.f32 %v2521_v57, %v1937_v24  ;;  %v763_v39 = vmul.f32 %v2532_v61, %v1937_v24 }
  0x7f   : > { %v863_v60 = vmul.f32 %v2609_v50, %v1939_v25  ;;  %v979_v63 = vadd.f32 %v947_v58, %v879_v8  ;;  %v980_v10 = vadd.f32 %v948_v19, %v880_v62  ;;  %v864_v11 = vmul.f32 %v2616_v14, %v1939_v25 }
  0x80   : > { %v594_v35 = vadd.f32 %v562_v38, %v493_v32  ;;  %v595_v55 = vadd.f32 %v563_v51, %v494_v53  ;;  %v963_v48 = vmul.f32 %v2623_v1, %v1952_v33  ;;  %v964_v49 = vmul.f32 %v2626_v4, %v1952_v33 }
  0x81   : > { %v1063_v58 = vmul.f32 %v1944_v26, %v2629_v20  ;;  %v1079_v19 = vadd.f32 %v1047_v40, %v979_v63  ;;  %v1080_v27 = vadd.f32 %v1048_v42, %v980_v10  ;;  %v247_v7 = vmul.f32 %v2444_v9, %v1924_v16  ;;  %v2650_v9 = vld [vmem:[%s1922_s9 + $0x172] sm:$0xff] }
  0x82   : > { %v694_v0 = vadd.f32 %v662_v56, %v594_v35  ;;  %v695_v44 = vadd.f32 %v663_v28, %v595_v55  ;;  %v248_v2 = vmul.f32 %v2451_v47, %v1924_v16  ;;  %v347_v46 = vmul.f32 %v2458_v15, %v1926_v17  ;;  %v2676_v35 = vld [vmem:[%s1922_s9 + $0xc8] sm:$0xff] }
  0x83   : > { %v348_v45 = vmul.f32 %v2461_v52, %v1926_v17  ;;  %v1106_v12 = vpack.c.bf16 %v1080_v27, %v1079_v19  ;;  %v447_v26 = vmul.f32 %v2464_v5, %v1928_v18  ;;  %v448_v40 = vmul.f32 %v2485_v36, %v1928_v18  ;;  %v2658_v5 = vld [vmem:[%s2984_s1 + $0x8] ss:$0 sm:$0xff]  ;;  %v2684_v19 = vld [vmem:[%s1922_s9 + $0xc9] sm:$0xff] }
  0x84   : > { %v794_v30 = vadd.f32 %v762_v29, %v694_v0  ;;  %v795_v38 = vadd.f32 %v763_v39, %v695_v44  ;;  %v379_v42 = vadd.f32 %v347_v46, %v247_v7  ;;  %v548_v15 = vmul.f32 %v2558_v31, %v1933_v22  ;;  %v2673_v39 = vld [vmem:[%s1922_s9 + $0xc0] sm:$0xff] }
  0x85   : > { %v380_v47 = vadd.f32 %v348_v45, %v248_v2  ;;  %1701 = vmatmul.mubr.msk.bf16.gmra.mrb[8].mxu0 %vm1125_vm2, %v1106_v12  ;;  %v1064_v36 = vmul.f32 %v2658_v5, %v2650_v9  ;;  %v549_v13 = vmul.f32 %v2561_v59, %v1933_v22  ;;  %v648_v51 = vmul.f32 %v2568_v37, %v1935_v23  ;;  %v2681_v55 = vld [vmem:[%s1922_s9 + $0xc1] sm:$0xff] }
  0x86   : > { %v895_v52 = vadd.f32 %v863_v60, %v794_v30  ;;  %v896_v56 = vadd.f32 %v864_v11, %v795_v38  ;;  %v479_v8 = vadd.f32 %v447_v26, %v379_v42  ;;  %v649_v32 = vmul.f32 %v2571_v54, %v1935_v23 }
  0x87   : > { %v480_v62 = vadd.f32 %v448_v40, %v380_v47  ;;  %v748_v53 = vmul.f32 %v2578_v3, %v1937_v24  ;;  %v749_v29 = vmul.f32 %v2595_v34, %v1937_v24  ;;  %v849_v11 = vmul.f32 %v2673_v39, %v1939_v25  ;;  %v1629_v47 = vld [vmem:[%s1922_s9 + $0xc2] sm:$0xff] }
  0x88   : > { %v995_v28 = vadd.f32 %v963_v48, %v895_v52  ;;  %v996_v60 = vadd.f32 %v964_v49, %v896_v56  ;;  %v580_v63 = vadd.f32 %v548_v15, %v479_v8  ;;  %v850_v27 = vmul.f32 %v2676_v35, %v1939_v25 }
  0x89   : > { %v581_v10 = vadd.f32 %v549_v13, %v480_v62  ;;  %v949_v49 = vmul.f32 %v2681_v55, %v1952_v33  ;;  %v950_v0 = vmul.f32 %v2684_v19, %v1952_v33  ;;  %v263_v46 = vmul.f32 %v2501_v41, %v1924_v16  ;;  %v2706_v41 = vld [vmem:[%s1922_s9 + $0xca] sm:$0xff] }
  0x8a   : > { %v1095_v48 = vadd.f32 %v1063_v58, %v995_v28  ;;  %v1096_v7 = vadd.f32 %v1064_v36, %v996_v60  ;;  %v680_v44 = vadd.f32 %v648_v51, %v580_v63  ;;  %v264_v58 = vmul.f32 %v2506_v6, %v1924_v16  ;;  %v2728_v60 = vld [vmem:[%s1922_s9 + $0x188] sm:$0xff] }
  0x8b   : > { %v681_v2 = vadd.f32 %v649_v32, %v581_v10  ;;  %v363_v45 = vmul.f32 %v2511_v21, %v1926_v17  ;;  %v364_v12 = vmul.f32 %v2516_v43, %v1926_v17  ;;  %v463_v30 = vmul.f32 %v2521_v57, %v1928_v18 }
  0x8c   : > { %v1114_v26 = vpack.c.bf16 %v1096_v7, %v1095_v48  ;;  %v780_v40 = vadd.f32 %v748_v53, %v680_v44  ;;  %v464_v42 = vmul.f32 %v2532_v61, %v1928_v18  ;;  %v564_v21 = vmul.f32 %v2609_v50, %v1933_v22 }
  0x8d   : > { %v781_v38 = vadd.f32 %v749_v29, %v681_v2  ;;  %v395_v15 = vadd.f32 %v363_v45, %v263_v46  ;;  %v396_v6 = vadd.f32 %v364_v12, %v264_v58  ;;  %v565_v43 = vmul.f32 %v2616_v14, %v1933_v22  ;;  %v2725_v29 = vld [vmem:[%s1922_s9 + $0x180] sm:$0xff] }
  0x8e   : > { %1717 = vmatmul.mubr.msk.bf16.gmra.mrb[8].mxu1 %vm1125_vm2, %v1114_v26  ;;  %v881_v57 = vadd.f32 %v849_v11, %v780_v40  ;;  %v1049_v36 = vmul.f32 %v2658_v5, %v1629_v47  ;;  %v1050_v61 = vmul.f32 %v2658_v5, %v2706_v41  ;;  %v664_v56 = vmul.f32 %v2623_v1, %v1935_v23  ;;  %v2749_v26 = vld [vmem:[%s1922_s9 + $0x182] sm:$0xff] }
  0x8f   : > { %v882_v52 = vadd.f32 %v850_v27, %v781_v38  ;;  %v495_v13 = vadd.f32 %v463_v30, %v395_v15  ;;  %v496_v51 = vadd.f32 %v464_v42, %v396_v6  ;;  %v665_v8 = vmul.f32 %v2626_v4, %v1935_v23  ;;  %v2735_v27 = vld [vmem:[%s1922_s9 + $0x181] sm:$0xff] }
  0x90   : > { %v981_v62 = vadd.f32 %v949_v49, %v881_v57  ;;  %v764_v28 = vmul.f32 %v2629_v20, %v1937_v24  ;;  %v765_v53 = vmul.f32 %v2650_v9, %v1937_v24  ;;  %v865_v11 = vmul.f32 %v2725_v29, %v1939_v25  ;;  %v2738_v49 = vld [vmem:[%s1922_s9 + $0x189] sm:$0xff]  ;;  %v1567_v57 = vld [vmem:[%s1922_s9 + $0xd8] sm:$0xff] }
  0x91   : > { %v982_v32 = vadd.f32 %v950_v0, %v882_v52  ;;  %v596_v63 = vadd.f32 %v564_v21, %v495_v13  ;;  %v597_v10 = vadd.f32 %v565_v43, %v496_v51  ;;  %v866_v48 = vmul.f32 %v2728_v60, %v1939_v25  ;;  %v1646_v21 = vld [vmem:[%s1922_s9 + $0x18a] sm:$0xff]  ;;  %v1568_v13 = vld [vmem:[%s1922_s9 + $0xe0] sm:$0xff] }
  0x92   : > { %v1081_v0 = vadd.f32 %v1049_v36, %v981_v62  ;;  %v965_v44 = vmul.f32 %v2735_v27, %v1952_v33  ;;  %v966_v2 = vmul.f32 %v2738_v49, %v1952_v33  ;;  %v249_v45 = vmul.f32 %v2558_v31, %v1924_v16  ;;  %v1599_v51 = vld [vmem:[%s1922_s9 + $0xd9] sm:$0xff] }
  0x93   : > { %v1082_v7 = vadd.f32 %v1050_v61, %v982_v32  ;;  %v696_v46 = vadd.f32 %v664_v56, %v596_v63  ;;  %v697_v58 = vadd.f32 %v665_v8, %v597_v10  ;;  %v250_v12 = vmul.f32 %v2561_v59, %v1924_v16  ;;  %v1600_v32 = vld [vmem:[%s1922_s9 + $0xe1] sm:$0xff] }
  0x94   : > { %v349_v40 = vmul.f32 %v2568_v37, %v1926_v17  ;;  %v350_v38 = vmul.f32 %v2571_v54, %v1926_v17  ;;  %v449_v42 = vmul.f32 %v2578_v3, %v1928_v18  ;;  %v1065_v59 = vmul.f32 %v2658_v5, %v2749_v26 }
  0x95   : > { %v1107_v30 = vpack.c.bf16 %v1082_v7, %v1081_v0  ;;  %v796_v15 = vadd.f32 %v764_v28, %v696_v46  ;;  %v797_v31 = vadd.f32 %v765_v53, %v697_v58  ;;  %v450_v6 = vmul.f32 %v2595_v34, %v1928_v18  ;;  %v1631_v46 = vld [vmem:[%s1922_s9 + $0xda] sm:$0xff]  ;;  %v1632_v58 = vld [vmem:[%s1922_s9 + $0xe2] sm:$0xff] }
  0x96   : > { %v381_v37 = vadd.f32 %v349_v40, %v249_v45  ;;  %v382_v43 = vadd.f32 %v350_v38, %v250_v12  ;;  %v550_v54 = vmul.f32 %v2673_v39, %v1933_v22  ;;  %v551_v3 = vmul.f32 %v2676_v35, %v1933_v22 }
  0x97   : > { %1704 = vmatprep.mubr.msk.bf16.mxu0 %vm1125_vm2, %v1107_v30  ;;  %v897_v52 = vadd.f32 %v865_v11, %v796_v15  ;;  %v898_v36 = vadd.f32 %v866_v48, %v797_v31  ;;  %v1066_v61 = vmul.f32 %v2658_v5, %v1646_v21  ;;  %v650_v34 = vmul.f32 %v2681_v55, %v1935_v23 }
  0x98   : > { %v481_v56 = vadd.f32 %v449_v42, %v381_v37  ;;  %v482_v8 = vadd.f32 %v450_v6, %v382_v43  ;;  %v651_v62 = vmul.f32 %v2684_v19, %v1935_v23  ;;  %v750_v39 = vmul.f32 %v1629_v47, %v1937_v24  ;;  %v1583_v6 = vld [vmem:[%s1922_s9 + $0x198] sm:$0xff] }
  0x99   : > { %v997_v35 = vadd.f32 %v965_v44, %v897_v52  ;;  %v998_v28 = vadd.f32 %v966_v2, %v898_v36  ;;  %v751_v53 = vmul.f32 %v2706_v41, %v1937_v24  ;;  %v851_v63 = vmul.f32 %v1567_v57, %v1939_v25  ;;  %v1615_v52 = vld [vmem:[%s1922_s9 + $0x199] sm:$0xff] }
  0x9a   : > { %v582_v55 = vadd.f32 %v550_v54, %v481_v56  ;;  %v583_v10 = vadd.f32 %v551_v3, %v482_v8  ;;  %v852_v11 = vmul.f32 %v1568_v13, %v1939_v25  ;;  %v951_v48 = vmul.f32 %v1599_v51, %v1952_v33  ;;  %v1647_v51 = vld [vmem:[%s1922_s9 + $0x19a] sm:$0xff] }
  0x9b   : > { %v1097_v0 = vadd.f32 %v1065_v59, %v997_v35  ;;  %v1098_v19 = vadd.f32 %v1066_v61, %v998_v28  ;;  %v952_v47 = vmul.f32 %v1600_v32, %v1952_v33  ;;  %v265_v7 = vmul.f32 %v2609_v50, %v1924_v16 }
  0x9c   : > { %v682_v44 = vadd.f32 %v650_v34, %v582_v55  ;;  %v683_v2 = vadd.f32 %v651_v62, %v583_v10  ;;  %v266_v41 = vmul.f32 %v2616_v14, %v1924_v16  ;;  %v365_v45 = vmul.f32 %v2623_v1, %v1926_v17  ;;  %v1648_v62 = vld [vmem:[%s1922_s9 + $0x1a2] sm:$0xff] }
  0x9d   : > { %v1115_v12 = vpack.c.bf16 %v1098_v19, %v1097_v0  ;;  %v366_v30 = vmul.f32 %v2626_v4, %v1926_v17  ;;  %v465_v40 = vmul.f32 %v2629_v20, %v1928_v18  ;;  %v466_v50 = vmul.f32 %v2650_v9, %v1928_v18 }
  0x9e   : > { %v782_v38 = vadd.f32 %v750_v39, %v682_v44  ;;  %v783_v42 = vadd.f32 %v751_v53, %v683_v2  ;;  %v397_v15 = vadd.f32 %v365_v45, %v265_v7  ;;  %v566_v16 = vmul.f32 %v2725_v29, %v1933_v22 }
  0x9f   : > { %1720 = vmatprep.mubr.msk.bf16.mxu1 %vm1125_vm2, %v1115_v12  ;;  %v1051_v14 = vmul.f32 %v2658_v5, %v1631_v46  ;;  %v1052_v17 = vmul.f32 %v2658_v5, %v1632_v58  ;;  %v398_v1 = vadd.f32 %v366_v30, %v266_v41  ;;  %v567_v4 = vmul.f32 %v2728_v60, %v1933_v22  ;;  %v1584_v22 = vld [vmem:[%s1922_s9 + $0x1a0] sm:$0xff] }
  0xa0   : > { %v883_v18 = vadd.f32 %v851_v63, %v782_v38  ;;  %v884_v20 = vadd.f32 %v852_v11, %v783_v42  ;;  %v497_v9 = vadd.f32 %v465_v40, %v397_v15  ;;  %v666_v31 = vmul.f32 %v2735_v27, %v1935_v23 }
  0xa1   : > { %v498_v29 = vadd.f32 %v466_v50, %v398_v1  ;;  %v667_v59 = vmul.f32 %v2738_v49, %v1935_v23  ;;  %v766_v3 = vmul.f32 %v2749_v26, %v1937_v24  ;;  %v767_v57 = vmul.f32 %v1646_v21, %v1937_v24  ;;  %v1616_v23 = vld [vmem:[%s1922_s9 + $0x1a1] sm:$0xff]  ;;  %s1774_s9 = sshll.u32 %s1835_s8, 4  ;;  %s1775_s9 = int_to_ptr.vmem [resolvable:$false] %s1774_s9 }
  0xa2   : > { %v983_v37 = vadd.f32 %v951_v48, %v883_v18  ;;  %v984_v43 = vadd.f32 %v952_v47, %v884_v20  ;;  %v598_v54 = vadd.f32 %v566_v16, %v497_v9  ;;  %v867_v34 = vmul.f32 %v1583_v6, %v1939_v25  ;;  %s1776_s10 = scalar_lea.vmem %s1775_s9, 8192  ;;  %p1777_p0 = scmp.lt.s32.totalorder %s2931_s29, %s1775_s9 }
  0xa3   : > { %v599_v60 = vadd.f32 %v567_v4, %v498_v29  ;;  %v868_v13 = vmul.f32 %v1584_v22, %v1939_v25  ;;  %v967_v26 = vmul.f32 %v1615_v52, %v1952_v33  ;;  %v968_v24 = vmul.f32 %v1616_v23, %v1952_v33  ;;  %v2831_v33 = vld [vmem:[%s2986_s3] ss:$0 sm:$0xff]  ;;  %p1778_p1 = scmp.lt.s32.totalorder %s1776_s10, %s1770_s7 }
  0xa4   : > { %v1083_v27 = vadd.f32 %v1051_v14, %v983_v37  ;;  %v1084_v36 = vadd.f32 %v1052_v17, %v984_v43  ;;  %v698_v61 = vadd.f32 %v666_v31, %v598_v54  ;;  %v1067_v32 = vmul.f32 %v2658_v5, %v1647_v51 }
  0xa5   : > { %v699_v49 = vadd.f32 %v667_v59, %v599_v60  ;;  %v1068_v28 = vmul.f32 %v2658_v5, %v1648_v62  ;;  %p1779_p2 = por %p1778_p1, %p1777_p0 }
  0xa6   : > { %v1108_v56 = vpack.c.bf16 %v1084_v36, %v1083_v27  ;;  %v798_v8 = vadd.f32 %v766_v3, %v698_v61 }
  0xa7   : > { %v799_v39 = vadd.f32 %v767_v57, %v699_v49  ;;  %p1780_p3 = pnand %p1779_p2, %p1773_p13 }
  0xa8   : > { %1705 = vmatmul.mubr.msk.bf16.gmra.mrb[12].mxu0 %vm1125_vm2, %v1108_v56  ;;  %v899_v21 = vadd.f32 %v867_v34, %v798_v8 }
  0xa9   : > { %v900_v35 = vadd.f32 %v868_v13, %v799_v39 }
  0xaa   : > { %v999_v25 = vadd.f32 %v967_v26, %v899_v21 }
  0xab   : > { %v1000_v53 = vadd.f32 %v968_v24, %v900_v35 }
  0xac   : > { %v1099_v63 = vadd.f32 %v1067_v32, %v999_v25 }
  0xad   : > { %v1100_v55 = vadd.f32 %v1068_v28, %v1000_v53 }
  0xaf   : > { %v1116_v10 = vpack.c.bf16 %v1100_v55, %v1099_v63 }
  0xb1   : > { %1721 = vmatmul.mubr.msk.bf16.gmra.mrb[12].mxu1 %vm1125_vm2, %v1116_v10 }
 0x112   : > { %v1694_v11 = vpop.f32.mrb[0].mxu0 }
 0x113   : > { %v1224_v48 = vadd.f32 %v1694_v11, %v2831_v33  ;;  %v1215_v5 = vpop.f32.mrb[1].mxu0 }
 0x114   : > { %v1216_v0 = vadd.f32 %v2831_v33, %v1215_v5  ;;  %v1695_v19 = vpop.f32.mrb[2].mxu0 }
 0x115   : > { %1345 = vst.msk [vmem:[%s2835_s27 + $0x10] sm:$0xff] %vm1342_vm3, %v1224_v48  ;;  %v1227_v47 = vadd.f32 %v1695_v19, %v2831_v33  ;;  %v1218_v7 = vpop.f32.mrb[3].mxu0 }
 0x116   : > { %1343 = vst.msk [vmem:[%s2835_s27] sm:$0xff] %vm1342_vm3, %v1216_v0  ;;  %v1219_v44 = vadd.f32 %v2831_v33, %v1218_v7 }
 0x117   : > { %1346 = vst.msk [vmem:[%s2835_s27 + $0x18] sm:$0xff] %vm1342_vm3, %v1227_v47 }
 0x118   : > { %1344 = vst.msk [vmem:[%s2835_s27 + $0x8] sm:$0xff] %vm1342_vm3, %v1219_v44 }
 0x11b   : > { %v1710_v2 = vpop.f32.mrb[0].mxu1 }
 0x11c   : > { %v1288_v46 = vadd.f32 %v1710_v2, %v2831_v33  ;;  %v1279_v58 = vpop.f32.mrb[1].mxu1 }
 0x11d   : > { %v1280_v41 = vadd.f32 %v2831_v33, %v1279_v58  ;;  %v1711_v45 = vpop.f32.mrb[2].mxu1 }
 0x11e   : > { %1361 = vst.msk [vmem:[%s2835_s27 + $0x90] sm:$0xff] %vm1342_vm3, %v1288_v46  ;;  %v1291_v12 = vadd.f32 %v1711_v45, %v2831_v33  ;;  %v1282_v30 = vpop.f32.mrb[3].mxu1 }
 0x11f   : > { %1359 = vst.msk [vmem:[%s2835_s27 + $0x80] sm:$0xff] %vm1342_vm3, %v1280_v41  ;;  %v1283_v40 = vadd.f32 %v2831_v33, %v1282_v30 }
 0x120   : > { %1362 = vst.msk [vmem:[%s2835_s27 + $0x98] sm:$0xff] %vm1342_vm3, %v1291_v12 }
 0x121   : > { %1360 = vst.msk [vmem:[%s2835_s27 + $0x88] sm:$0xff] %vm1342_vm3, %v1283_v40 }
 0x135   : > { %v1698_v50 = vpop.f32.mrb[4].mxu0 }
 0x136   : > { %v1240_v38 = vadd.f32 %v1698_v50, %v2831_v33  ;;  %v1231_v42 = vpop.f32.mrb[5].mxu0 }
 0x137   : > { %v1232_v15 = vadd.f32 %v2831_v33, %v1231_v42  ;;  %v1699_v16 = vpop.f32.mrb[6].mxu0 }
 0x138   : > { %1349 = vst.msk [vmem:[%s2835_s27 + $0x30] sm:$0xff] %vm1342_vm3, %v1240_v38  ;;  %v1243_v14 = vadd.f32 %v1699_v16, %v2831_v33  ;;  %v1234_v17 = vpop.f32.mrb[7].mxu0 }
 0x139   : > { %1347 = vst.msk [vmem:[%s2835_s27 + $0x20] sm:$0xff] %vm1342_vm3, %v1232_v15  ;;  %v1235_v1 = vadd.f32 %v2831_v33, %v1234_v17 }
 0x13a   : > { %1350 = vst.msk [vmem:[%s2835_s27 + $0x38] sm:$0xff] %vm1342_vm3, %v1243_v14 }
 0x13b   : > { %1348 = vst.msk [vmem:[%s2835_s27 + $0x28] sm:$0xff] %vm1342_vm3, %v1235_v1 }
 0x13e   : > { %v1714_v4 = vpop.f32.mrb[4].mxu1 }
 0x13f   : > { %v1304_v18 = vadd.f32 %v1714_v4, %v2831_v33  ;;  %v1295_v20 = vpop.f32.mrb[5].mxu1 }
 0x140   : > { %v1296_v9 = vadd.f32 %v2831_v33, %v1295_v20  ;;  %v1715_v31 = vpop.f32.mrb[6].mxu1 }
 0x141   : > { %1365 = vst.msk [vmem:[%s2835_s27 + $0xb0] sm:$0xff] %vm1342_vm3, %v1304_v18  ;;  %v1307_v29 = vadd.f32 %v1715_v31, %v2831_v33  ;;  %v1298_v59 = vpop.f32.mrb[7].mxu1 }
 0x142   : > { %1363 = vst.msk [vmem:[%s2835_s27 + $0xa0] sm:$0xff] %vm1342_vm3, %v1296_v9  ;;  %v1299_v6 = vadd.f32 %v2831_v33, %v1298_v59 }
 0x143   : > { %1366 = vst.msk [vmem:[%s2835_s27 + $0xb8] sm:$0xff] %vm1342_vm3, %v1307_v29 }
 0x144   : > { %1364 = vst.msk [vmem:[%s2835_s27 + $0xa8] sm:$0xff] %vm1342_vm3, %v1299_v6 }
 0x158   : > { %v1702_v37 = vpop.f32.mrb[8].mxu0 }
 0x159   : > { %v1256_v43 = vadd.f32 %v1702_v37, %v2831_v33  ;;  %v1247_v54 = vpop.f32.mrb[9].mxu0 }
 0x15a   : > { %v1248_v3 = vadd.f32 %v2831_v33, %v1247_v54  ;;  %v1703_v22 = vpop.f32.mrb[10].mxu0 }
 0x15b   : > { %1353 = vst.msk [vmem:[%s2835_s27 + $0x50] sm:$0xff] %vm1342_vm3, %v1256_v43  ;;  %v1259_v60 = vadd.f32 %v1703_v22, %v2831_v33  ;;  %v1250_v57 = vpop.f32.mrb[11].mxu0 }
 0x15c   : > { %1351 = vst.msk [vmem:[%s2835_s27 + $0x40] sm:$0xff] %vm1342_vm3, %v1248_v3  ;;  %v1251_v52 = vadd.f32 %v2831_v33, %v1250_v57 }
 0x15d   : > { %1354 = vst.msk [vmem:[%s2835_s27 + $0x58] sm:$0xff] %vm1342_vm3, %v1259_v60 }
 0x15e   : > { %1352 = vst.msk [vmem:[%s2835_s27 + $0x48] sm:$0xff] %vm1342_vm3, %v1251_v52 }
 0x161   : > { %v1718_v27 = vpop.f32.mrb[8].mxu1 }
 0x162   : > { %v1320_v36 = vadd.f32 %v1718_v27, %v2831_v33  ;;  %v1311_v61 = vpop.f32.mrb[9].mxu1 }
 0x163   : > { %v1312_v34 = vadd.f32 %v2831_v33, %v1311_v61  ;;  %v1719_v23 = vpop.f32.mrb[10].mxu1 }
 0x164   : > { %1369 = vst.msk [vmem:[%s2835_s27 + $0xd0] sm:$0xff] %vm1342_vm3, %v1320_v36  ;;  %v1323_v49 = vadd.f32 %v1719_v23, %v2831_v33  ;;  %v1314_v13 = vpop.f32.mrb[11].mxu1 }
 0x165   : > { %1367 = vst.msk [vmem:[%s2835_s27 + $0xc0] sm:$0xff] %vm1342_vm3, %v1312_v34  ;;  %v1315_v51 = vadd.f32 %v2831_v33, %v1314_v13 }
 0x166   : > { %1370 = vst.msk [vmem:[%s2835_s27 + $0xd8] sm:$0xff] %vm1342_vm3, %v1323_v49 }
 0x167   : > { %1368 = vst.msk [vmem:[%s2835_s27 + $0xc8] sm:$0xff] %vm1342_vm3, %v1315_v51 }
 0x17b   : > { %v1706_v56 = vpop.f32.mrb[12].mxu0 }
 0x17c   : > { %v1272_v8 = vadd.f32 %v1706_v56, %v2831_v33  ;;  %v1263_v26 = vpop.f32.mrb[13].mxu0 }
 0x17d   : > { %v1264_v62 = vadd.f32 %v2831_v33, %v1263_v26  ;;  %v1707_v39 = vpop.f32.mrb[14].mxu0 }
 0x17e   : > { %1357 = vst.msk [vmem:[%s2835_s27 + $0x70] sm:$0xff] %vm1342_vm3, %v1272_v8  ;;  %v1275_v24 = vadd.f32 %v1707_v39, %v2831_v33  ;;  %v1266_v21 = vpop.f32.mrb[15].mxu0 }
 0x17f   : > { %1355 = vst.msk [vmem:[%s2835_s27 + $0x60] sm:$0xff] %vm1342_vm3, %v1264_v62  ;;  %v1267_v32 = vadd.f32 %v2831_v33, %v1266_v21 }
 0x180   : > { %1358 = vst.msk [vmem:[%s2835_s27 + $0x78] sm:$0xff] %vm1342_vm3, %v1275_v24 }
 0x181   : > { %1356 = vst.msk [vmem:[%s2835_s27 + $0x68] sm:$0xff] %vm1342_vm3, %v1267_v32 }
 0x184   : > { %v1722_v35 = vpop.f32.mrb[12].mxu1 }
 0x185   : > { %v1336_v28 = vadd.f32 %v1722_v35, %v2831_v33  ;;  %v1327_v25 = vpop.f32.mrb[13].mxu1 }
 0x186   : > { %v1328_v53 = vadd.f32 %v2831_v33, %v1327_v25  ;;  %v1723_v63 = vpop.f32.mrb[14].mxu1 }
 0x187   : > { %1373 = vst.msk [vmem:[%s2835_s27 + $0xf0] sm:$0xff] %vm1342_vm3, %v1336_v28  ;;  %v1339_v55 = vadd.f32 %v1723_v63, %v2831_v33  ;;  %v1330_v10 = vpop.f32.mrb[15].mxu1 }
 0x188   : > { %1371 = vst.msk [vmem:[%s2835_s27 + $0xe0] sm:$0xff] %vm1342_vm3, %v1328_v53  ;;  %v1331_v11 = vadd.f32 %v2831_v33, %v1330_v10 }
 0x189   : > { %1374 = vst.msk [vmem:[%s2835_s27 + $0xf8] sm:$0xff] %vm1342_vm3, %v1339_v55 }
 0x18a   : > { %1372 = vst.msk [vmem:[%s2835_s27 + $0xe8] sm:$0xff] %vm1342_vm3, %v1331_v11 }
 0x18b   : > { %1783 = shalt.err (!%p1780_p3)
}
 0x18c   : > { %s1784_s11 = scalar_lea.hbm %s2929_s6, 4096  ;;  %s1788_s14 = scalar_lea.hbm %s2987_s4, 8192 }
 0x18d   : > { %p1785_p4 = scmp.ne.s32.totalorder %s2929_s6, %s1784_s11  ;;  %p1789_p9 = scmp.lt.u32.totalorder %s2929_s6, %s2987_s4 }
 0x18e   : > { %p1790_p10 = scmp.lt.u32.totalorder %s1788_s14, %s1784_s11  ;;  %p1792_p12 = scmp.lt.u32.totalorder %s1784_s11, %s2929_s6 }
 0x18f   : > { %p1786_p7 = pnand %p1785_p4, %p1901_p5 }
 0x190   : > { %p1791_p11 = por %p1790_p10, %p1789_p9 }
 0x191   : > { %p1787_p8 = pneg %p1786_p7 }
 0x192   : > { %p1793_p13 = por %p1792_p12, %p1791_p11 }
 0x194   : > { %p1794_p0 = pnand %p1793_p13, %p1787_p8 }
 0x196   : > { %1797 = shalt.err (!%p1794_p0)
}
 0x197   : > { %s1836_s23 = smov 128   ;;  %s1837_s27 = smov 8  }
 0x198   : > { %1727 = dma.vmem_to_hbm [thread:$0]  (%p1901_p5), %s2931_s29, 4096, %s2929_s6, %s2942_s19, %s1836_s23, %s1836_s23, %s1837_s27  }
 0x199 PF: > { %p1733_p1 = scmp.ge.s32.totalorder %s1832_s18, 2  ;;  %s1404_s28 = sand.u32 1, %s1820_s15  }
 0x19a   : > { %s1405_s30 = scalar_lea.sflag [#allocation3], %s1404_s28 }
 0x19b   : > { %p1730_p2 = pnand %p1733_p1, %p1905_p6 }
 0x19d   : > { %1815 = dma.done.wait (!%p1730_p2), %s1405_s30, 4096  }
 0x19e   : > { %1817 = vsyncadd (!%p1730_p2), %s1405_s30, 4294963200  ;;  %p14_p3 = scmp.ge.s32.totalorder %s1888_s21, 4   ;;  %s2990_s15 = smov %s1824_s16 }
 0x19f   : > { %s2991_s16 = smov %s1828_s17  ;;  %s2992_s17 = smov %s1899_s24 }
 0x1a0   : > { %s2993_s18 = smov %s1888_s21  ;;  %16 = sbr.rel (!%p14_p3) target bundleno = 3 (0x3), region = 73 }
 0x1a7   :  { %1410 = vsyncpa [#allocation3], 1 }
 0x1a8   :  { %1412 = vsyncpa [#allocation3 + $0x1], 1 }

</bundles_post_ra>
